<compile_context>
chip_gen: v5e
topology: v5e:2x2
jax: 0.10.0
libtpu: 0.0.40
codegen_flags: <defaults>
</compile_context>

<pallas_src>
import functools

import jax
import jax.numpy as jnp
from jax.experimental import pallas as pl
from jax.experimental.pallas import tpu as pltpu


# --------------------------------------------------------------------------------------
# Kernel: one encoder layer for one batch element.
#   x_ref : (1, H+2, W+2, Cin)  f32   zero-padded NHWC input
#   w_ref : (9, Cin, Cout)      bf16  BN-folded conv taps (row-major ky*3+kx)
#   b_ref : (1, Cout)           f32   folded bias
#   o_ref : (1, Ho, Wo, Cout)   f32
# --------------------------------------------------------------------------------------
def _conv_bn_relu_pool_kernel(x_ref, w_ref, b_ref, o_ref, *scratch,
                              H, W, Cin, Cout, pool, compute_dtype):
    # ---- 3x3 conv as 9 shifted-window MXU matmuls, f32 accumulation ----
    acc = jnp.zeros((H * W, Cout), jnp.float32)
    for ky in range(3):
        for kx in range(3):
            win = x_ref[0, ky:ky + H, kx:kx + W, :]                  # (H, W, Cin) f32
            lhs = win.reshape(H * W, Cin).astype(compute_dtype)      # aligned f32 reshape
            acc = acc + jnp.dot(lhs, w_ref[ky * 3 + kx],
                                preferred_element_type=jnp.float32)

    # ---- folded (conv bias + BatchNorm affine) and ReLU, in f32 ----
    y = jnp.maximum(acc + b_ref[...], 0.0)                           # (H*W, Cout)

    if pool:
        stage_ref, = scratch
        # Vertical 2:1 max: row pairs (2m, 2m+1) are sublane blocks at offsets 0 and W.
        yv = y.reshape(H // 2, 2 * W, Cout)
        vmax = jnp.maximum(yv[:, :W, :], yv[:, W:, :])               # (H//2, W, Cout)
        # Horizontal 2:1 max: even/odd columns via sublane-strided loads from VMEM.
        stage_ref[...] = vmax.reshape((H // 2) * W, Cout)
        half = (H // 2) * (W // 2)
        hmax = jnp.maximum(stage_ref[pl.ds(0, half, 2), :],
                           stage_ref[pl.ds(1, half, 2), :])          # (half, Cout)
        o_ref[0] = hmax.reshape(H // 2, W // 2, Cout).astype(o_ref.dtype)
    else:
        o_ref[0] = y.reshape(H, W, Cout).astype(o_ref.dtype)


# --------------------------------------------------------------------------------------
# Per-layer wrapper.
# --------------------------------------------------------------------------------------
def conv_bn_relu_pool(x, w_taps, b, *, pool, compute_dtype=jnp.bfloat16):
    """x: (B, H, W, Cin) f32 NHWC.  w_taps: (9, Cin, Cout) f32 (BN-folded).  b: (1, Cout) f32."""
    B, H, W, Cin = x.shape
    Cout = w_taps.shape[-1]
    assert W % 8 == 0, "W must be a multiple of 8 (tile-aligned (H,W,C)<->(H*W,C) reshapes)"
    if pool:
        assert H % 2 == 0 and W % 2 == 0 and (W // 2) % 8 == 0
        Ho, Wo = H // 2, W // 2
    else:
        Ho, Wo = H, W

    # "Same" zero padding staged once in XLA (cheap fused pad); the kernel only reads the
    # nine shifted windows it needs -- no in-kernel zero-fill or staging copies.
    xp = jnp.pad(x.astype(jnp.float32), ((0, 0), (1, 1), (1, 1), (0, 0)))

    kernel = functools.partial(_conv_bn_relu_pool_kernel,
                               H=H, W=W, Cin=Cin, Cout=Cout, pool=pool,
                               compute_dtype=compute_dtype)

    flops = 2 * B * H * W * 9 * Cin * Cout
    bytes_accessed = (xp.size * 4                    # f32 padded activations
                      + 9 * Cin * Cout * 2           # bf16 folded weights
                      + Cout * 4                     # folded bias
                      + B * Ho * Wo * Cout * 4)      # f32 output

    scratch = [pltpu.VMEM(((H // 2) * W, Cout), jnp.float32)] if pool else []

    return pl.pallas_call(
        kernel,
        grid=(B,),
        in_specs=[
            pl.BlockSpec((1, H + 2, W + 2, Cin), lambda bi: (bi, 0, 0, 0)),
            pl.BlockSpec((9, Cin, Cout), lambda bi: (0, 0, 0)),
            pl.BlockSpec((1, Cout), lambda bi: (0, 0)),
        ],
        out_specs=pl.BlockSpec((1, Ho, Wo, Cout), lambda bi: (bi, 0, 0, 0)),
        out_shape=jax.ShapeDtypeStruct((B, Ho, Wo, Cout), jnp.float32),
        scratch_shapes=scratch,
        compiler_params=pltpu.CompilerParams(dimension_semantics=("parallel",)),
        cost_estimate=pl.CostEstimate(flops=flops, transcendentals=0,
                                      bytes_accessed=bytes_accessed),
    )(xp, w_taps.astype(compute_dtype), b)


# --------------------------------------------------------------------------------------
# Full Encoder forward (NCHW in / NCHW out, matching the PyTorch module).
# --------------------------------------------------------------------------------------
def encoder_forward(x_nchw, params, *, compute_dtype=jnp.bfloat16):
    x = jnp.transpose(x_nchw, (0, 2, 3, 1)).astype(jnp.float32)   # NCHW -> lane-dense NHWC
    n = len(params)
    for i, layer in enumerate(params):
        x = conv_bn_relu_pool(x, layer["w"], layer["b"],
                              pool=(i < n - 1), compute_dtype=compute_dtype)
    return jnp.transpose(x, (0, 3, 1, 2))                         # back to NCHW


# --------------------------------------------------------------------------------------
# Host-side parameter prep (BN folding) and init.
# --------------------------------------------------------------------------------------
def fold_layer(conv_w, conv_b, gamma, beta, running_mean, running_var, eps=1e-5):
    """Fold eval-mode BatchNorm + conv bias into the conv weights, once, host-side."""
    cout, cin, kh, kw = conv_w.shape
    scale = gamma / jnp.sqrt(running_var + eps)                           # (Cout,)
    w = jnp.transpose(conv_w, (2, 3, 1, 0)).reshape(kh * kw, cin, cout)   # (9, Cin, Cout)
    w = w * scale[None, None, :]
    b = ((conv_b - running_mean) * scale + beta)[None, :]                 # (1, Cout)
    return {"w": w.astype(jnp.float32), "b": b.astype(jnp.float32)}


def init_raw_params(key, num_kernels, kernel_size=3):
    """PyTorch-style init: Conv2d uniform(+/-1/sqrt(fan_in)); randomized BN stats."""
    layers = []
    for i in range(len(num_kernels) - 1):
        cin, cout = num_kernels[i], num_kernels[i + 1]
        key, *ks = jax.random.split(key, 7)
        bound = (cin * kernel_size * kernel_size) ** -0.5
        layers.append(dict(
            conv_w=jax.random.uniform(ks[0], (cout, cin, kernel_size, kernel_size),
                                      jnp.float32, -bound, bound),
            conv_b=jax.random.uniform(ks[1], (cout,), jnp.float32, -bound, bound),
            gamma=jax.random.uniform(ks[2], (cout,), jnp.float32, 0.5, 1.5),
            beta=0.1 * jax.random.normal(ks[3], (cout,), jnp.float32),
            running_mean=0.1 * jax.random.normal(ks[4], (cout,), jnp.float32),
            running_var=jax.random.uniform(ks[5], (cout,), jnp.float32, 0.5, 1.5),
        ))
    return layers


def encoder_reference(x_nchw, raw_params, eps=1e-5):
    """Pure-JAX f32 reference reproducing the PyTorch Encoder (eval-mode BN)."""
    x = x_nchw
    n = len(raw_params)
    for i, p in enumerate(raw_params):
        x = jax.lax.conv_general_dilated(
            x, p["conv_w"], window_strides=(1, 1), padding=((1, 1), (1, 1)),
            dimension_numbers=("NCHW", "OIHW", "NCHW"),
            precision=jax.lax.Precision.HIGHEST)
        x = x + p["conv_b"][None, :, None, None]
        scale = p["gamma"] / jnp.sqrt(p["running_var"] + eps)
        shift = p["beta"] - p["running_mean"] * scale
        x = jnp.maximum(x * scale[None, :, None, None] + shift[None, :, None, None], 0.0)
        if i < n - 1:
            x = jax.lax.reduce_window(x, -jnp.inf, jax.lax.max,
                                      (1, 1, 2, 2), (1, 1, 2, 2), "VALID")
    return x


if __name__ == "__main__":
    B, Hin, Win = 2, 16, 16
    num_kernels = [4, 32, 64]          # Encoder([4, 32, 64]) -> two conv layers

    key = jax.random.PRNGKey(0)
    k_x, k_p = jax.random.split(key)
    x_nchw = jax.random.normal(k_x, (B, num_kernels[0], Hin, Win), jnp.float32)

    raw = init_raw_params(k_p, num_kernels)
    params = [fold_layer(**layer) for layer in raw]

    fwd = jax.jit(encoder_forward)
    out = jax.block_until_ready(fwd(x_nchw, params))

    # two layers, MaxPool2d(2) after layer 1 only -> (B, 64, 8, 8)
    assert out.shape == (B, num_kernels[-1], Hin // 2, Win // 2), out.shape
    assert out.dtype == jnp.float32

    ref = encoder_reference(x_nchw, raw)
    err = float(jnp.max(jnp.abs(out - ref)))
    scale = float(jnp.max(jnp.abs(ref)))
    assert err <= 0.05 * scale + 1e-3, (err, scale)   # bf16-MXU tolerance vs f32 reference
    print("KERNEL_OK")
</pallas_src>

<mosaic_0001>
module attributes {stable_mosaic.version = 11 : i64} {
  func.func @_conv_bn_relu_pool_kernel(%arg0: i32, %arg1: memref<1x18x18x4xf32, #tpu.memory_space<vmem>>, %arg2: memref<9x4x32xbf16, #tpu.memory_space<vmem>>, %arg3: memref<1x32xf32, #tpu.memory_space<vmem>>, %arg4: memref<1x8x8x32xf32, #tpu.memory_space<vmem>>, %arg5: memref<128x32xf32, #tpu.memory_space<vmem>>) attributes {dimension_semantics = [#tpu.dimension_semantics<parallel>], iteration_bounds = array<i64: 2>, scalar_prefetch = 0 : i64, scratch_operands = 1 : i64, tpu.core_type = #tpu.core_type<tc>, window_params = [{transform_indices = @transform_0, window_bounds = array<i64: 1, 18, 18, 4>}, {pipeline_mode = #tpu.pipeline_mode<synchronous>, transform_indices = @transform_1, window_bounds = array<i64: 9, 4, 32>}, {pipeline_mode = #tpu.pipeline_mode<synchronous>, transform_indices = @transform_2, window_bounds = array<i64: 1, 32>}, {transform_indices = @transform_3, window_bounds = array<i64: 1, 8, 8, 32>}]} {
    %cst = arith.constant 0.000000e+00 : f32
    %0 = vector.broadcast %cst : f32 to vector<256x32xf32>
    %c0 = arith.constant 0 : index
    %c0_0 = arith.constant 0 : index
    %c0_1 = arith.constant 0 : index
    %c0_2 = arith.constant 0 : index
    %1 = vector.load %arg1[%c0, %c0_0, %c0_1, %c0_2] : memref<1x18x18x4xf32, #tpu.memory_space<vmem>>, vector<1x16x16x4xf32>
    %2 = vector.shape_cast %1 : vector<1x16x16x4xf32> to vector<16x16x4xf32>
    %3 = vector.shape_cast %2 : vector<16x16x4xf32> to vector<256x4xf32>
    %4 = arith.truncf %3 : vector<256x4xf32> to vector<256x4xbf16>
    %c0_3 = arith.constant 0 : index
    %c0_4 = arith.constant 0 : index
    %c0_5 = arith.constant 0 : index
    %5 = vector.load %arg2[%c0_3, %c0_4, %c0_5] : memref<9x4x32xbf16, #tpu.memory_space<vmem>>, vector<1x4x32xbf16>
    %6 = vector.shape_cast %5 : vector<1x4x32xbf16> to vector<4x32xbf16>
    %cst_6 = arith.constant dense<0.000000e+00> : vector<256x32xf32>
    %7 = tpu.matmul %4, %6, %cst_6 {dimension_numbers = #tpu.dot_dimension_numbers<[1], [0], [0], [1], [0, 0, 1, 1], [], []>} : vector<256x4xbf16>, vector<4x32xbf16>, vector<256x32xf32> -> vector<256x32xf32>
    %8 = arith.addf %0, %7 : vector<256x32xf32>
    %c0_7 = arith.constant 0 : index
    %c0_8 = arith.constant 0 : index
    %c1 = arith.constant 1 : index
    %c0_9 = arith.constant 0 : index
    %9 = vector.load %arg1[%c0_7, %c0_8, %c1, %c0_9] : memref<1x18x18x4xf32, #tpu.memory_space<vmem>>, vector<1x16x16x4xf32>
    %10 = vector.shape_cast %9 : vector<1x16x16x4xf32> to vector<16x16x4xf32>
    %11 = vector.shape_cast %10 : vector<16x16x4xf32> to vector<256x4xf32>
    %12 = arith.truncf %11 : vector<256x4xf32> to vector<256x4xbf16>
    %c1_10 = arith.constant 1 : index
    %c0_11 = arith.constant 0 : index
    %c0_12 = arith.constant 0 : index
    %13 = vector.load %arg2[%c1_10, %c0_11, %c0_12] : memref<9x4x32xbf16, #tpu.memory_space<vmem>>, vector<1x4x32xbf16>
    %14 = vector.shape_cast %13 : vector<1x4x32xbf16> to vector<4x32xbf16>
    %cst_13 = arith.constant dense<0.000000e+00> : vector<256x32xf32>
    %15 = tpu.matmul %12, %14, %cst_13 {dimension_numbers = #tpu.dot_dimension_numbers<[1], [0], [0], [1], [0, 0, 1, 1], [], []>} : vector<256x4xbf16>, vector<4x32xbf16>, vector<256x32xf32> -> vector<256x32xf32>
    %16 = arith.addf %8, %15 : vector<256x32xf32>
    %c0_14 = arith.constant 0 : index
    %c0_15 = arith.constant 0 : index
    %c2 = arith.constant 2 : index
    %c0_16 = arith.constant 0 : index
    %17 = vector.load %arg1[%c0_14, %c0_15, %c2, %c0_16] : memref<1x18x18x4xf32, #tpu.memory_space<vmem>>, vector<1x16x16x4xf32>
    %18 = vector.shape_cast %17 : vector<1x16x16x4xf32> to vector<16x16x4xf32>
    %19 = vector.shape_cast %18 : vector<16x16x4xf32> to vector<256x4xf32>
    %20 = arith.truncf %19 : vector<256x4xf32> to vector<256x4xbf16>
    %c2_17 = arith.constant 2 : index
    %c0_18 = arith.constant 0 : index
    %c0_19 = arith.constant 0 : index
    %21 = vector.load %arg2[%c2_17, %c0_18, %c0_19] : memref<9x4x32xbf16, #tpu.memory_space<vmem>>, vector<1x4x32xbf16>
    %22 = vector.shape_cast %21 : vector<1x4x32xbf16> to vector<4x32xbf16>
    %cst_20 = arith.constant dense<0.000000e+00> : vector<256x32xf32>
    %23 = tpu.matmul %20, %22, %cst_20 {dimension_numbers = #tpu.dot_dimension_numbers<[1], [0], [0], [1], [0, 0, 1, 1], [], []>} : vector<256x4xbf16>, vector<4x32xbf16>, vector<256x32xf32> -> vector<256x32xf32>
    %24 = arith.addf %16, %23 : vector<256x32xf32>
    %c0_21 = arith.constant 0 : index
    %c1_22 = arith.constant 1 : index
    %c0_23 = arith.constant 0 : index
    %c0_24 = arith.constant 0 : index
    %25 = vector.load %arg1[%c0_21, %c1_22, %c0_23, %c0_24] : memref<1x18x18x4xf32, #tpu.memory_space<vmem>>, vector<1x16x16x4xf32>
    %26 = vector.shape_cast %25 : vector<1x16x16x4xf32> to vector<16x16x4xf32>
    %27 = vector.shape_cast %26 : vector<16x16x4xf32> to vector<256x4xf32>
    %28 = arith.truncf %27 : vector<256x4xf32> to vector<256x4xbf16>
    %c3 = arith.constant 3 : index
    %c0_25 = arith.constant 0 : index
    %c0_26 = arith.constant 0 : index
    %29 = vector.load %arg2[%c3, %c0_25, %c0_26] : memref<9x4x32xbf16, #tpu.memory_space<vmem>>, vector<1x4x32xbf16>
    %30 = vector.shape_cast %29 : vector<1x4x32xbf16> to vector<4x32xbf16>
    %cst_27 = arith.constant dense<0.000000e+00> : vector<256x32xf32>
    %31 = tpu.matmul %28, %30, %cst_27 {dimension_numbers = #tpu.dot_dimension_numbers<[1], [0], [0], [1], [0, 0, 1, 1], [], []>} : vector<256x4xbf16>, vector<4x32xbf16>, vector<256x32xf32> -> vector<256x32xf32>
    %32 = arith.addf %24, %31 : vector<256x32xf32>
    %c0_28 = arith.constant 0 : index
    %c1_29 = arith.constant 1 : index
    %c1_30 = arith.constant 1 : index
    %c0_31 = arith.constant 0 : index
    %33 = vector.load %arg1[%c0_28, %c1_29, %c1_30, %c0_31] : memref<1x18x18x4xf32, #tpu.memory_space<vmem>>, vector<1x16x16x4xf32>
    %34 = vector.shape_cast %33 : vector<1x16x16x4xf32> to vector<16x16x4xf32>
    %35 = vector.shape_cast %34 : vector<16x16x4xf32> to vector<256x4xf32>
    %36 = arith.truncf %35 : vector<256x4xf32> to vector<256x4xbf16>
    %c4 = arith.constant 4 : index
    %c0_32 = arith.constant 0 : index
    %c0_33 = arith.constant 0 : index
    %37 = vector.load %arg2[%c4, %c0_32, %c0_33] : memref<9x4x32xbf16, #tpu.memory_space<vmem>>, vector<1x4x32xbf16>
    %38 = vector.shape_cast %37 : vector<1x4x32xbf16> to vector<4x32xbf16>
    %cst_34 = arith.constant dense<0.000000e+00> : vector<256x32xf32>
    %39 = tpu.matmul %36, %38, %cst_34 {dimension_numbers = #tpu.dot_dimension_numbers<[1], [0], [0], [1], [0, 0, 1, 1], [], []>} : vector<256x4xbf16>, vector<4x32xbf16>, vector<256x32xf32> -> vector<256x32xf32>
    %40 = arith.addf %32, %39 : vector<256x32xf32>
    %c0_35 = arith.constant 0 : index
    %c1_36 = arith.constant 1 : index
    %c2_37 = arith.constant 2 : index
    %c0_38 = arith.constant 0 : index
    %41 = vector.load %arg1[%c0_35, %c1_36, %c2_37, %c0_38] : memref<1x18x18x4xf32, #tpu.memory_space<vmem>>, vector<1x16x16x4xf32>
    %42 = vector.shape_cast %41 : vector<1x16x16x4xf32> to vector<16x16x4xf32>
    %43 = vector.shape_cast %42 : vector<16x16x4xf32> to vector<256x4xf32>
    %44 = arith.truncf %43 : vector<256x4xf32> to vector<256x4xbf16>
    %c5 = arith.constant 5 : index
    %c0_39 = arith.constant 0 : index
    %c0_40 = arith.constant 0 : index
    %45 = vector.load %arg2[%c5, %c0_39, %c0_40] : memref<9x4x32xbf16, #tpu.memory_space<vmem>>, vector<1x4x32xbf16>
    %46 = vector.shape_cast %45 : vector<1x4x32xbf16> to vector<4x32xbf16>
    %cst_41 = arith.constant dense<0.000000e+00> : vector<256x32xf32>
    %47 = tpu.matmul %44, %46, %cst_41 {dimension_numbers = #tpu.dot_dimension_numbers<[1], [0], [0], [1], [0, 0, 1, 1], [], []>} : vector<256x4xbf16>, vector<4x32xbf16>, vector<256x32xf32> -> vector<256x32xf32>
    %48 = arith.addf %40, %47 : vector<256x32xf32>
    %c0_42 = arith.constant 0 : index
    %c2_43 = arith.constant 2 : index
    %c0_44 = arith.constant 0 : index
    %c0_45 = arith.constant 0 : index
    %49 = vector.load %arg1[%c0_42, %c2_43, %c0_44, %c0_45] : memref<1x18x18x4xf32, #tpu.memory_space<vmem>>, vector<1x16x16x4xf32>
    %50 = vector.shape_cast %49 : vector<1x16x16x4xf32> to vector<16x16x4xf32>
    %51 = vector.shape_cast %50 : vector<16x16x4xf32> to vector<256x4xf32>
    %52 = arith.truncf %51 : vector<256x4xf32> to vector<256x4xbf16>
    %c6 = arith.constant 6 : index
    %c0_46 = arith.constant 0 : index
    %c0_47 = arith.constant 0 : index
    %53 = vector.load %arg2[%c6, %c0_46, %c0_47] : memref<9x4x32xbf16, #tpu.memory_space<vmem>>, vector<1x4x32xbf16>
    %54 = vector.shape_cast %53 : vector<1x4x32xbf16> to vector<4x32xbf16>
    %cst_48 = arith.constant dense<0.000000e+00> : vector<256x32xf32>
    %55 = tpu.matmul %52, %54, %cst_48 {dimension_numbers = #tpu.dot_dimension_numbers<[1], [0], [0], [1], [0, 0, 1, 1], [], []>} : vector<256x4xbf16>, vector<4x32xbf16>, vector<256x32xf32> -> vector<256x32xf32>
    %56 = arith.addf %48, %55 : vector<256x32xf32>
    %c0_49 = arith.constant 0 : index
    %c2_50 = arith.constant 2 : index
    %c1_51 = arith.constant 1 : index
    %c0_52 = arith.constant 0 : index
    %57 = vector.load %arg1[%c0_49, %c2_50, %c1_51, %c0_52] : memref<1x18x18x4xf32, #tpu.memory_space<vmem>>, vector<1x16x16x4xf32>
    %58 = vector.shape_cast %57 : vector<1x16x16x4xf32> to vector<16x16x4xf32>
    %59 = vector.shape_cast %58 : vector<16x16x4xf32> to vector<256x4xf32>
    %60 = arith.truncf %59 : vector<256x4xf32> to vector<256x4xbf16>
    %c7 = arith.constant 7 : index
    %c0_53 = arith.constant 0 : index
    %c0_54 = arith.constant 0 : index
    %61 = vector.load %arg2[%c7, %c0_53, %c0_54] : memref<9x4x32xbf16, #tpu.memory_space<vmem>>, vector<1x4x32xbf16>
    %62 = vector.shape_cast %61 : vector<1x4x32xbf16> to vector<4x32xbf16>
    %cst_55 = arith.constant dense<0.000000e+00> : vector<256x32xf32>
    %63 = tpu.matmul %60, %62, %cst_55 {dimension_numbers = #tpu.dot_dimension_numbers<[1], [0], [0], [1], [0, 0, 1, 1], [], []>} : vector<256x4xbf16>, vector<4x32xbf16>, vector<256x32xf32> -> vector<256x32xf32>
    %64 = arith.addf %56, %63 : vector<256x32xf32>
    %c0_56 = arith.constant 0 : index
    %c2_57 = arith.constant 2 : index
    %c2_58 = arith.constant 2 : index
    %c0_59 = arith.constant 0 : index
    %65 = vector.load %arg1[%c0_56, %c2_57, %c2_58, %c0_59] : memref<1x18x18x4xf32, #tpu.memory_space<vmem>>, vector<1x16x16x4xf32>
    %66 = vector.shape_cast %65 : vector<1x16x16x4xf32> to vector<16x16x4xf32>
    %67 = vector.shape_cast %66 : vector<16x16x4xf32> to vector<256x4xf32>
    %68 = arith.truncf %67 : vector<256x4xf32> to vector<256x4xbf16>
    %c8 = arith.constant 8 : index
    %c0_60 = arith.constant 0 : index
    %c0_61 = arith.constant 0 : index
    %69 = vector.load %arg2[%c8, %c0_60, %c0_61] : memref<9x4x32xbf16, #tpu.memory_space<vmem>>, vector<1x4x32xbf16>
    %70 = vector.shape_cast %69 : vector<1x4x32xbf16> to vector<4x32xbf16>
    %cst_62 = arith.constant dense<0.000000e+00> : vector<256x32xf32>
    %71 = tpu.matmul %68, %70, %cst_62 {dimension_numbers = #tpu.dot_dimension_numbers<[1], [0], [0], [1], [0, 0, 1, 1], [], []>} : vector<256x4xbf16>, vector<4x32xbf16>, vector<256x32xf32> -> vector<256x32xf32>
    %72 = arith.addf %64, %71 : vector<256x32xf32>
    %c0_63 = arith.constant 0 : index
    %c0_64 = arith.constant 0 : index
    %73 = vector.load %arg3[%c0_63, %c0_64] : memref<1x32xf32, #tpu.memory_space<vmem>>, vector<1x32xf32>
    %74 = vector.broadcast %73 : vector<1x32xf32> to vector<256x32xf32>
    %75 = arith.addf %72, %74 : vector<256x32xf32>
    %cst_65 = arith.constant 0.000000e+00 : f32
    %76 = vector.broadcast %cst_65 : f32 to vector<256x32xf32>
    %77 = arith.maximumf %75, %76 : vector<256x32xf32>
    %78 = vector.shape_cast %77 : vector<256x32xf32> to vector<8x32x32xf32>
    %79 = vector.extract_strided_slice %78 {offsets = [0, 0, 0], sizes = [8, 16, 32], strides = [1, 1, 1]} : vector<8x32x32xf32> to vector<8x16x32xf32>
    %80 = vector.extract_strided_slice %78 {offsets = [0, 16, 0], sizes = [8, 16, 32], strides = [1, 1, 1]} : vector<8x32x32xf32> to vector<8x16x32xf32>
    %81 = arith.maximumf %79, %80 : vector<8x16x32xf32>
    %82 = vector.shape_cast %81 : vector<8x16x32xf32> to vector<128x32xf32>
    %c0_66 = arith.constant 0 : index
    %c0_67 = arith.constant 0 : index
    %83 = vector.load %arg5[%c0_66, %c0_67] : memref<128x32xf32, #tpu.memory_space<vmem>>, vector<128x32xf32>
    tpu.vector_store %arg5[%c0_66, %c0_67], %82 {strides = array<i32>} : memref<128x32xf32, #tpu.memory_space<vmem>>, vector<128x32xf32>,
    %c0_68 = arith.constant 0 : index
    %c0_69 = arith.constant 0 : index
    %84 = tpu.strided_load %arg5[%c0_68, %c0_69] {strides = array<i32: 2, 1>} : memref<128x32xf32, #tpu.memory_space<vmem>>, vector<64x32xf32>
    %c1_70 = arith.constant 1 : index
    %c0_71 = arith.constant 0 : index
    %85 = tpu.strided_load %arg5[%c1_70, %c0_71] {strides = array<i32: 2, 1>} : memref<128x32xf32, #tpu.memory_space<vmem>>, vector<64x32xf32>
    %86 = arith.maximumf %84, %85 : vector<64x32xf32>
    %87 = vector.shape_cast %86 : vector<64x32xf32> to vector<8x8x32xf32>
    %c0_72 = arith.constant 0 : index
    %c0_73 = arith.constant 0 : index
    %c0_74 = arith.constant 0 : index
    %c0_75 = arith.constant 0 : index
    %88 = vector.load %arg4[%c0_72, %c0_73, %c0_74, %c0_75] : memref<1x8x8x32xf32, #tpu.memory_space<vmem>>, vector<1x8x8x32xf32>
    %89 = vector.shape_cast %88 : vector<1x8x8x32xf32> to vector<8x8x32xf32>
    %90 = vector.shape_cast %87 : vector<8x8x32xf32> to vector<1x8x8x32xf32>
    tpu.vector_store %arg4[%c0_72, %c0_73, %c0_74, %c0_75], %90 {strides = array<i32>} : memref<1x8x8x32xf32, #tpu.memory_space<vmem>>, vector<1x8x8x32xf32>,
    return
  }
  func.func @transform_0(%arg0: i32) -> (i32, i32, i32, i32) {
    %c0_i32 = arith.constant 0 : i32
    %c0_i32_0 = arith.constant 0 : i32
    %c0_i32_1 = arith.constant 0 : i32
    %c0_i32_2 = arith.constant 0 : i32
    return %arg0, %c0_i32, %c0_i32_0, %c0_i32_1 : i32, i32, i32, i32
  }
  func.func @transform_1(%arg0: i32) -> (i32, i32, i32) {
    %c0_i32 = arith.constant 0 : i32
    %c0_i32_0 = arith.constant 0 : i32
    %c0_i32_1 = arith.constant 0 : i32
    %c0_i32_2 = arith.constant 0 : i32
    return %c0_i32, %c0_i32_0, %c0_i32_1 : i32, i32, i32
  }
  func.func @transform_2(%arg0: i32) -> (i32, i32) {
    %c0_i32 = arith.constant 0 : i32
    %c0_i32_0 = arith.constant 0 : i32
    %c0_i32_1 = arith.constant 0 : i32
    return %c0_i32, %c0_i32_0 : i32, i32
  }
  func.func @transform_3(%arg0: i32) -> (i32, i32, i32, i32) {
    %c0_i32 = arith.constant 0 : i32
    %c0_i32_0 = arith.constant 0 : i32
    %c0_i32_1 = arith.constant 0 : i32
    %c0_i32_2 = arith.constant 0 : i32
    return %arg0, %c0_i32, %c0_i32_0, %c0_i32_1 : i32, i32, i32, i32
  }
}

module attributes {stable_mosaic.version = 11 : i64} {
  func.func @_conv_bn_relu_pool_kernel(%arg0: i32, %arg1: memref<1x10x10x32xf32, #tpu.memory_space<vmem>>, %arg2: memref<9x32x64xbf16, #tpu.memory_space<vmem>>, %arg3: memref<1x64xf32, #tpu.memory_space<vmem>>, %arg4: memref<1x8x8x64xf32, #tpu.memory_space<vmem>>) attributes {dimension_semantics = [#tpu.dimension_semantics<parallel>], iteration_bounds = array<i64: 2>, scalar_prefetch = 0 : i64, scratch_operands = 0 : i64, tpu.core_type = #tpu.core_type<tc>, window_params = [{transform_indices = @transform_0, window_bounds = array<i64: 1, 10, 10, 32>}, {pipeline_mode = #tpu.pipeline_mode<synchronous>, transform_indices = @transform_1, window_bounds = array<i64: 9, 32, 64>}, {pipeline_mode = #tpu.pipeline_mode<synchronous>, transform_indices = @transform_2, window_bounds = array<i64: 1, 64>}, {transform_indices = @transform_3, window_bounds = array<i64: 1, 8, 8, 64>}]} {
    %cst = arith.constant 0.000000e+00 : f32
    %0 = vector.broadcast %cst : f32 to vector<64x64xf32>
    %c0 = arith.constant 0 : index
    %c0_0 = arith.constant 0 : index
    %c0_1 = arith.constant 0 : index
    %c0_2 = arith.constant 0 : index
    %1 = vector.load %arg1[%c0, %c0_0, %c0_1, %c0_2] : memref<1x10x10x32xf32, #tpu.memory_space<vmem>>, vector<1x8x8x32xf32>
    %2 = vector.shape_cast %1 : vector<1x8x8x32xf32> to vector<8x8x32xf32>
    %3 = vector.shape_cast %2 : vector<8x8x32xf32> to vector<64x32xf32>
    %4 = arith.truncf %3 : vector<64x32xf32> to vector<64x32xbf16>
    %c0_3 = arith.constant 0 : index
    %c0_4 = arith.constant 0 : index
    %c0_5 = arith.constant 0 : index
    %5 = vector.load %arg2[%c0_3, %c0_4, %c0_5] : memref<9x32x64xbf16, #tpu.memory_space<vmem>>, vector<1x32x64xbf16>
    %6 = vector.shape_cast %5 : vector<1x32x64xbf16> to vector<32x64xbf16>
    %cst_6 = arith.constant dense<0.000000e+00> : vector<64x64xf32>
    %7 = tpu.matmul %4, %6, %cst_6 {dimension_numbers = #tpu.dot_dimension_numbers<[1], [0], [0], [1], [0, 0, 1, 1], [], []>} : vector<64x32xbf16>, vector<32x64xbf16>, vector<64x64xf32> -> vector<64x64xf32>
    %8 = arith.addf %0, %7 : vector<64x64xf32>
    %c0_7 = arith.constant 0 : index
    %c0_8 = arith.constant 0 : index
    %c1 = arith.constant 1 : index
    %c0_9 = arith.constant 0 : index
    %9 = vector.load %arg1[%c0_7, %c0_8, %c1, %c0_9] : memref<1x10x10x32xf32, #tpu.memory_space<vmem>>, vector<1x8x8x32xf32>
    %10 = vector.shape_cast %9 : vector<1x8x8x32xf32> to vector<8x8x32xf32>
    %11 = vector.shape_cast %10 : vector<8x8x32xf32> to vector<64x32xf32>
    %12 = arith.truncf %11 : vector<64x32xf32> to vector<64x32xbf16>
    %c1_10 = arith.constant 1 : index
    %c0_11 = arith.constant 0 : index
    %c0_12 = arith.constant 0 : index
    %13 = vector.load %arg2[%c1_10, %c0_11, %c0_12] : memref<9x32x64xbf16, #tpu.memory_space<vmem>>, vector<1x32x64xbf16>
    %14 = vector.shape_cast %13 : vector<1x32x64xbf16> to vector<32x64xbf16>
    %cst_13 = arith.constant dense<0.000000e+00> : vector<64x64xf32>
    %15 = tpu.matmul %12, %14, %cst_13 {dimension_numbers = #tpu.dot_dimension_numbers<[1], [0], [0], [1], [0, 0, 1, 1], [], []>} : vector<64x32xbf16>, vector<32x64xbf16>, vector<64x64xf32> -> vector<64x64xf32>
    %16 = arith.addf %8, %15 : vector<64x64xf32>
    %c0_14 = arith.constant 0 : index
    %c0_15 = arith.constant 0 : index
    %c2 = arith.constant 2 : index
    %c0_16 = arith.constant 0 : index
    %17 = vector.load %arg1[%c0_14, %c0_15, %c2, %c0_16] : memref<1x10x10x32xf32, #tpu.memory_space<vmem>>, vector<1x8x8x32xf32>
    %18 = vector.shape_cast %17 : vector<1x8x8x32xf32> to vector<8x8x32xf32>
    %19 = vector.shape_cast %18 : vector<8x8x32xf32> to vector<64x32xf32>
    %20 = arith.truncf %19 : vector<64x32xf32> to vector<64x32xbf16>
    %c2_17 = arith.constant 2 : index
    %c0_18 = arith.constant 0 : index
    %c0_19 = arith.constant 0 : index
    %21 = vector.load %arg2[%c2_17, %c0_18, %c0_19] : memref<9x32x64xbf16, #tpu.memory_space<vmem>>, vector<1x32x64xbf16>
    %22 = vector.shape_cast %21 : vector<1x32x64xbf16> to vector<32x64xbf16>
    %cst_20 = arith.constant dense<0.000000e+00> : vector<64x64xf32>
    %23 = tpu.matmul %20, %22, %cst_20 {dimension_numbers = #tpu.dot_dimension_numbers<[1], [0], [0], [1], [0, 0, 1, 1], [], []>} : vector<64x32xbf16>, vector<32x64xbf16>, vector<64x64xf32> -> vector<64x64xf32>
    %24 = arith.addf %16, %23 : vector<64x64xf32>
    %c0_21 = arith.constant 0 : index
    %c1_22 = arith.constant 1 : index
    %c0_23 = arith.constant 0 : index
    %c0_24 = arith.constant 0 : index
    %25 = vector.load %arg1[%c0_21, %c1_22, %c0_23, %c0_24] : memref<1x10x10x32xf32, #tpu.memory_space<vmem>>, vector<1x8x8x32xf32>
    %26 = vector.shape_cast %25 : vector<1x8x8x32xf32> to vector<8x8x32xf32>
    %27 = vector.shape_cast %26 : vector<8x8x32xf32> to vector<64x32xf32>
    %28 = arith.truncf %27 : vector<64x32xf32> to vector<64x32xbf16>
    %c3 = arith.constant 3 : index
    %c0_25 = arith.constant 0 : index
    %c0_26 = arith.constant 0 : index
    %29 = vector.load %arg2[%c3, %c0_25, %c0_26] : memref<9x32x64xbf16, #tpu.memory_space<vmem>>, vector<1x32x64xbf16>
    %30 = vector.shape_cast %29 : vector<1x32x64xbf16> to vector<32x64xbf16>
    %cst_27 = arith.constant dense<0.000000e+00> : vector<64x64xf32>
    %31 = tpu.matmul %28, %30, %cst_27 {dimension_numbers = #tpu.dot_dimension_numbers<[1], [0], [0], [1], [0, 0, 1, 1], [], []>} : vector<64x32xbf16>, vector<32x64xbf16>, vector<64x64xf32> -> vector<64x64xf32>
    %32 = arith.addf %24, %31 : vector<64x64xf32>
    %c0_28 = arith.constant 0 : index
    %c1_29 = arith.constant 1 : index
    %c1_30 = arith.constant 1 : index
    %c0_31 = arith.constant 0 : index
    %33 = vector.load %arg1[%c0_28, %c1_29, %c1_30, %c0_31] : memref<1x10x10x32xf32, #tpu.memory_space<vmem>>, vector<1x8x8x32xf32>
    %34 = vector.shape_cast %33 : vector<1x8x8x32xf32> to vector<8x8x32xf32>
    %35 = vector.shape_cast %34 : vector<8x8x32xf32> to vector<64x32xf32>
    %36 = arith.truncf %35 : vector<64x32xf32> to vector<64x32xbf16>
    %c4 = arith.constant 4 : index
    %c0_32 = arith.constant 0 : index
    %c0_33 = arith.constant 0 : index
    %37 = vector.load %arg2[%c4, %c0_32, %c0_33] : memref<9x32x64xbf16, #tpu.memory_space<vmem>>, vector<1x32x64xbf16>
    %38 = vector.shape_cast %37 : vector<1x32x64xbf16> to vector<32x64xbf16>
    %cst_34 = arith.constant dense<0.000000e+00> : vector<64x64xf32>
    %39 = tpu.matmul %36, %38, %cst_34 {dimension_numbers = #tpu.dot_dimension_numbers<[1], [0], [0], [1], [0, 0, 1, 1], [], []>} : vector<64x32xbf16>, vector<32x64xbf16>, vector<64x64xf32> -> vector<64x64xf32>
    %40 = arith.addf %32, %39 : vector<64x64xf32>
    %c0_35 = arith.constant 0 : index
    %c1_36 = arith.constant 1 : index
    %c2_37 = arith.constant 2 : index
    %c0_38 = arith.constant 0 : index
    %41 = vector.load %arg1[%c0_35, %c1_36, %c2_37, %c0_38] : memref<1x10x10x32xf32, #tpu.memory_space<vmem>>, vector<1x8x8x32xf32>
    %42 = vector.shape_cast %41 : vector<1x8x8x32xf32> to vector<8x8x32xf32>
    %43 = vector.shape_cast %42 : vector<8x8x32xf32> to vector<64x32xf32>
    %44 = arith.truncf %43 : vector<64x32xf32> to vector<64x32xbf16>
    %c5 = arith.constant 5 : index
    %c0_39 = arith.constant 0 : index
    %c0_40 = arith.constant 0 : index
    %45 = vector.load %arg2[%c5, %c0_39, %c0_40] : memref<9x32x64xbf16, #tpu.memory_space<vmem>>, vector<1x32x64xbf16>
    %46 = vector.shape_cast %45 : vector<1x32x64xbf16> to vector<32x64xbf16>
    %cst_41 = arith.constant dense<0.000000e+00> : vector<64x64xf32>
    %47 = tpu.matmul %44, %46, %cst_41 {dimension_numbers = #tpu.dot_dimension_numbers<[1], [0], [0], [1], [0, 0, 1, 1], [], []>} : vector<64x32xbf16>, vector<32x64xbf16>, vector<64x64xf32> -> vector<64x64xf32>
    %48 = arith.addf %40, %47 : vector<64x64xf32>
    %c0_42 = arith.constant 0 : index
    %c2_43 = arith.constant 2 : index
    %c0_44 = arith.constant 0 : index
    %c0_45 = arith.constant 0 : index
    %49 = vector.load %arg1[%c0_42, %c2_43, %c0_44, %c0_45] : memref<1x10x10x32xf32, #tpu.memory_space<vmem>>, vector<1x8x8x32xf32>
    %50 = vector.shape_cast %49 : vector<1x8x8x32xf32> to vector<8x8x32xf32>
    %51 = vector.shape_cast %50 : vector<8x8x32xf32> to vector<64x32xf32>
    %52 = arith.truncf %51 : vector<64x32xf32> to vector<64x32xbf16>
    %c6 = arith.constant 6 : index
    %c0_46 = arith.constant 0 : index
    %c0_47 = arith.constant 0 : index
    %53 = vector.load %arg2[%c6, %c0_46, %c0_47] : memref<9x32x64xbf16, #tpu.memory_space<vmem>>, vector<1x32x64xbf16>
    %54 = vector.shape_cast %53 : vector<1x32x64xbf16> to vector<32x64xbf16>
    %cst_48 = arith.constant dense<0.000000e+00> : vector<64x64xf32>
    %55 = tpu.matmul %52, %54, %cst_48 {dimension_numbers = #tpu.dot_dimension_numbers<[1], [0], [0], [1], [0, 0, 1, 1], [], []>} : vector<64x32xbf16>, vector<32x64xbf16>, vector<64x64xf32> -> vector<64x64xf32>
    %56 = arith.addf %48, %55 : vector<64x64xf32>
    %c0_49 = arith.constant 0 : index
    %c2_50 = arith.constant 2 : index
    %c1_51 = arith.constant 1 : index
    %c0_52 = arith.constant 0 : index
    %57 = vector.load %arg1[%c0_49, %c2_50, %c1_51, %c0_52] : memref<1x10x10x32xf32, #tpu.memory_space<vmem>>, vector<1x8x8x32xf32>
    %58 = vector.shape_cast %57 : vector<1x8x8x32xf32> to vector<8x8x32xf32>
    %59 = vector.shape_cast %58 : vector<8x8x32xf32> to vector<64x32xf32>
    %60 = arith.truncf %59 : vector<64x32xf32> to vector<64x32xbf16>
    %c7 = arith.constant 7 : index
    %c0_53 = arith.constant 0 : index
    %c0_54 = arith.constant 0 : index
    %61 = vector.load %arg2[%c7, %c0_53, %c0_54] : memref<9x32x64xbf16, #tpu.memory_space<vmem>>, vector<1x32x64xbf16>
    %62 = vector.shape_cast %61 : vector<1x32x64xbf16> to vector<32x64xbf16>
    %cst_55 = arith.constant dense<0.000000e+00> : vector<64x64xf32>
    %63 = tpu.matmul %60, %62, %cst_55 {dimension_numbers = #tpu.dot_dimension_numbers<[1], [0], [0], [1], [0, 0, 1, 1], [], []>} : vector<64x32xbf16>, vector<32x64xbf16>, vector<64x64xf32> -> vector<64x64xf32>
    %64 = arith.addf %56, %63 : vector<64x64xf32>
    %c0_56 = arith.constant 0 : index
    %c2_57 = arith.constant 2 : index
    %c2_58 = arith.constant 2 : index
    %c0_59 = arith.constant 0 : index
    %65 = vector.load %arg1[%c0_56, %c2_57, %c2_58, %c0_59] : memref<1x10x10x32xf32, #tpu.memory_space<vmem>>, vector<1x8x8x32xf32>
    %66 = vector.shape_cast %65 : vector<1x8x8x32xf32> to vector<8x8x32xf32>
    %67 = vector.shape_cast %66 : vector<8x8x32xf32> to vector<64x32xf32>
    %68 = arith.truncf %67 : vector<64x32xf32> to vector<64x32xbf16>
    %c8 = arith.constant 8 : index
    %c0_60 = arith.constant 0 : index
    %c0_61 = arith.constant 0 : index
    %69 = vector.load %arg2[%c8, %c0_60, %c0_61] : memref<9x32x64xbf16, #tpu.memory_space<vmem>>, vector<1x32x64xbf16>
    %70 = vector.shape_cast %69 : vector<1x32x64xbf16> to vector<32x64xbf16>
    %cst_62 = arith.constant dense<0.000000e+00> : vector<64x64xf32>
    %71 = tpu.matmul %68, %70, %cst_62 {dimension_numbers = #tpu.dot_dimension_numbers<[1], [0], [0], [1], [0, 0, 1, 1], [], []>} : vector<64x32xbf16>, vector<32x64xbf16>, vector<64x64xf32> -> vector<64x64xf32>
    %72 = arith.addf %64, %71 : vector<64x64xf32>
    %c0_63 = arith.constant 0 : index
    %c0_64 = arith.constant 0 : index
    %73 = vector.load %arg3[%c0_63, %c0_64] : memref<1x64xf32, #tpu.memory_space<vmem>>, vector<1x64xf32>
    %74 = vector.broadcast %73 : vector<1x64xf32> to vector<64x64xf32>
    %75 = arith.addf %72, %74 : vector<64x64xf32>
    %cst_65 = arith.constant 0.000000e+00 : f32
    %76 = vector.broadcast %cst_65 : f32 to vector<64x64xf32>
    %77 = arith.maximumf %75, %76 : vector<64x64xf32>
    %78 = vector.shape_cast %77 : vector<64x64xf32> to vector<8x8x64xf32>
    %c0_66 = arith.constant 0 : index
    %c0_67 = arith.constant 0 : index
    %c0_68 = arith.constant 0 : index
    %c0_69 = arith.constant 0 : index
    %79 = vector.load %arg4[%c0_66, %c0_67, %c0_68, %c0_69] : memref<1x8x8x64xf32, #tpu.memory_space<vmem>>, vector<1x8x8x64xf32>
    %80 = vector.shape_cast %79 : vector<1x8x8x64xf32> to vector<8x8x64xf32>
    %81 = vector.shape_cast %78 : vector<8x8x64xf32> to vector<1x8x8x64xf32>
    tpu.vector_store %arg4[%c0_66, %c0_67, %c0_68, %c0_69], %81 {strides = array<i32>} : memref<1x8x8x64xf32, #tpu.memory_space<vmem>>, vector<1x8x8x64xf32>,
    return
  }
  func.func @transform_0(%arg0: i32) -> (i32, i32, i32, i32) {
    %c0_i32 = arith.constant 0 : i32
    %c0_i32_0 = arith.constant 0 : i32
    %c0_i32_1 = arith.constant 0 : i32
    %c0_i32_2 = arith.constant 0 : i32
    return %arg0, %c0_i32, %c0_i32_0, %c0_i32_1 : i32, i32, i32, i32
  }
  func.func @transform_1(%arg0: i32) -> (i32, i32, i32) {
    %c0_i32 = arith.constant 0 : i32
    %c0_i32_0 = arith.constant 0 : i32
    %c0_i32_1 = arith.constant 0 : i32
    %c0_i32_2 = arith.constant 0 : i32
    return %c0_i32, %c0_i32_0, %c0_i32_1 : i32, i32, i32
  }
  func.func @transform_2(%arg0: i32) -> (i32, i32) {
    %c0_i32 = arith.constant 0 : i32
    %c0_i32_0 = arith.constant 0 : i32
    %c0_i32_1 = arith.constant 0 : i32
    return %c0_i32, %c0_i32_0 : i32, i32
  }
  func.func @transform_3(%arg0: i32) -> (i32, i32, i32, i32) {
    %c0_i32 = arith.constant 0 : i32
    %c0_i32_0 = arith.constant 0 : i32
    %c0_i32_1 = arith.constant 0 : i32
    %c0_i32_2 = arith.constant 0 : i32
    return %arg0, %c0_i32, %c0_i32_0, %c0_i32_1 : i32, i32, i32, i32
  }
}

</mosaic_0001>

<bundles_post_ra>
// kernel: encoder_forward.3
= control target key start
LH: loop header
LB: loop body
LE: loop exit
PB: predicated region body
PF: predicated region fallthrough
CT: control target
= control target key end

     0   :  { %8 = vsyncpa [#allocation3], 0  ;;  %s1659_s0 = inlined_call_operand.vmem [shape: f32[2,10,10,32], index: 0, kind: input, shape index: {}]   ;;  %s1660_s1 = inlined_call_operand.vmem [shape: bf16[9,32,64], index: 1, kind: input, shape index: {}]   ;;  %s1661_s2 = inlined_call_operand.vmem [shape: f32[1,64], index: 2, kind: input, shape index: {}]   ;;  %s1662_s3 = inlined_call_operand.hbm [shape: f32[2,8,8,64], index: 3, kind: output, shape index: {}]  }
   0x1   :  { %10 = vsyncpa [#allocation3 + $0x1], 0  ;;  %s1318_s12 = smov 0   ;;  %s1320_s13 = smov 0  }
   0x2   :  { %s1322_s14 = smov 0   ;;  %s1324_s15 = smov 0  }
   0x3 LB: > { %s1339_s16 = sadd.s32 4294967295, %s1294_s15   ;;  %s965_s17 = sadd.s32 4294967294, %s1294_s15   ;;  %s1294_s15 = sphi %s1324_s15, %s1668_s15   ;;  %s1290_s14 = sphi %s1322_s14, %s1667_s14   ;;  %s1286_s13 = sphi %s1320_s13, %s1666_s13   ;;  %s1282_s12 = sphi %s1318_s12, %s1665_s12  }
   0x4   : > { %s1343_s18 = sadd.s32 1, %s1294_s15   ;;  %s91_s19 = sadd.s32 1, %s1290_s14 }
   0x5   : > { %s88_s20 = ssub.s32 %s1294_s15, %s1343_s18  ;;  %p101_p0 = scmp.ne.s32.totalorder %s1290_s14, %s1286_s13 }
   0x6   : > { %p89_p1 = scmp.eq.s32.totalorder %s88_s20, 0  ;;  %p102_p2 = scmp.eq.s32.totalorder %s1339_s16, 1 }
   0x7   : > { %p107_p3 = scmp.ne.s32.totalorder %s1286_s13, %s1282_s12  ;;  %p108_p4 = scmp.eq.s32.totalorder %s965_s17, 1 }
   0x8   : > { %s1354_s21 = scalar_select %p89_p1, %s1290_s14, %s91_s19  }
   0x9   : > { %p1356_p5 = por %p102_p2, %p101_p0  ;;  %p1360_p6 = por %p108_p4, %p107_p3 }
   0xa   : > { %p968_p7 = scmp.ge.s32.totalorder %s1294_s15, 1  ;;  %p140_p8 = scmp.lt.s32.totalorder %s1294_s15, 3 }
   0xc   : > { %p141_p9 = pnand %p968_p7, %p140_p8 }
   0xd   : > { %p164_p10 = scmp.lt.s32.totalorder (!%p141_p9), %s1339_s16, 1  ;;  %s1182_s7 = sshll.u32 (!%p141_p9), %s1339_s16, 6 }
   0xe   : > { %144 = sbr.rel (%p141_p9) target bundleno = 312 (0x138), region = 32  ;;  %s899_s10 = scalar_lea.hbm (!%p141_p9), %s1662_s3, %s1182_s7 }
   0xf   : > { %s902_s17 = sshll.u32 (!%p141_p9), %s899_s10, 4  ;;  %s1252_s27 = scalar_lea.hbm (!%p141_p9), %s1662_s3, 128  ;;  %s903_s17 = int_to_ptr.hbm [resolvable:$true] %s902_s17 }
  0x10   : > { %s1246_s20 = sshra.s32 (!%p141_p9), %s903_s17, 4  ;;  %s1247_s20 = int_to_ptr.hbm [resolvable:$true] %s1246_s20 }
  0x11   : > { %s1248_s24 = scalar_lea.hbm (!%p141_p9), %s1247_s20, 64  ;;  %p1253_p0 = scmp.lt.s32.totalorder (!%p141_p9), %s1247_s20, %s1662_s3 }
  0x12   : > { %p1249_p11 = scmp.ne.s32.totalorder (!%p141_p9), %s1247_s20, %s1248_s24  ;;  %p1254_p1 = scmp.lt.s32.totalorder (!%p141_p9), %s1252_s27, %s1248_s24 }
  0x13   : > { %v1167_v0 = vld [vmem:[%s1660_s1 + $0x18] sm:$0xff]  ;;  %v1166_v1 = vld [vmem:[%s1660_s1 + $0x10] sm:$0xff]  ;;  %s165_s28 = scalar_select %p164_p10, %s1339_s16, 1  ;;  %v1169_v2 = vld [vmem:[%s1660_s1 + $0x28] sm:$0xff]  ;;  %vm215_vm0 = vcmask 261120   ;;  %vm878_vm1 = vcmask 523264  }
  0x14   : > { %1183 = vmatpush.bf16.msra.mxu1 %v1167_v0  ;;  %1184 = vmatpush.bf16.msra.mxu2 %v1167_v0  ;;  %v1171_v3 = vld [vmem:[%s1660_s1 + $0x38] sm:$0xff]  ;;  %v1165_v4 = vld [vmem:[%s1660_s1 + $0x8] sm:$0xff]  ;;  %v1168_v6 = vld [vmem:[%s1660_s1 + $0x20] sm:$0xff]  ;;  %p1250_p12 = pnand %p1249_p11, %p1356_p5  ;;  %p1255_p2 = por %p1254_p1, %p1253_p0 }
  0x15   : > { %1185 = vmatpush.bf16.msra.mxu3 %v1167_v0  ;;  %234 = vmatpush.bf16.msra.mxu0 %v1167_v0  ;;  %s1189_s29 = smul.u32 160, %s165_s28  ;;  %v1173_v5 = vld [vmem:[%s1660_s1 + $0x48] sm:$0xff]  ;;  %v1170_v10 = vld [vmem:[%s1660_s1 + $0x30] sm:$0xff]  ;;  %v1164_v19 = vld [vmem:[%s1660_s1] sm:$0xff] }
  0x16   : > { %v1172_v21 = vld [vmem:[%s1660_s1 + $0x40] sm:$0xff]  ;;  %v1177_v22 = vld [vmem:[%s1660_s1 + $0x68] sm:$0xff]  ;;  %v1179_v23 = vld [vmem:[%s1660_s1 + $0x78] sm:$0xff]  ;;  %p1251_p13 = pneg %p1250_p12 }
  0x17   : > { %s1389_s19 = scalar_lea.vmem %s1659_s0, %s1189_s29  ;;  %v1175_v24 = vld [vmem:[%s1660_s1 + $0x58] sm:$0xff]  ;;  %v1181_v25 = vld [vmem:[%s1660_s1 + $0x88] sm:$0xff]  ;;  %v1176_v35 = vld [vmem:[%s1660_s1 + $0x60] sm:$0xff] }
  0x18   : > { %1186 = vmatpush.bf16.msra.mxu1 %v1166_v1  ;;  %1187 = vmatpush.bf16.msra.mxu2 %v1166_v1  ;;  %v188_v7 = vld [vmem:[%s1389_s19 + $0x21] sm:$0xff]  ;;  %v1396_v8 = vld [vmem:[%s1389_s19 + $0x31] sm:$0xff]  ;;  %p1256_p3 = pnand %p1255_p2, %p1251_p13 }
  0x19   : > { %1188 = vmatpush.bf16.msra.mxu3 %v1166_v1  ;;  %235 = vmatpush.bf16.msra.mxu0 %v1166_v1  ;;  %v1399_v9 = vld [vmem:[%s1389_s19 + $0x41] sm:$0xff]  ;;  %v1405_v11 = vpack.c.bf16 %v1396_v8, %v188_v7  ;;  %v1408_v12 = vld [vmem:[%s1389_s19 + $0x51] sm:$0xff] }
  0x1a   : > { %v1411_v13 = vld [vmem:[%s1389_s19 + $0x61] sm:$0xff]  ;;  %v1414_v14 = vld [vmem:[%s1389_s19 + $0x71] sm:$0xff]  ;;  %v1418_v15 = vpack.c.bf16 %v1408_v12, %v1399_v9  ;;  %v476_v46 = vpack.c.bf16 %v1399_v9, %v1396_v8 }
  0x1b   : > { %v1422_v16 = vpack.c.bf16 %v1414_v14, %v1411_v13  ;;  %v186_v17 = vld [vmem:[%s1389_s19 + $0x1] sm:$0xff]  ;;  %v187_v18 = vld [vmem:[%s1389_s19 + $0x11] sm:$0xff]  ;;  %984 = vmatmul.msk.bf16.vlgmr.msra.gmra.mxu1 %vm215_vm0, %v1405_v11  ;;  %v477_v54 = vpack.c.bf16 %v1411_v13, %v1408_v12 }
  0x1c   : > { %357 = vmatpush.bf16.msrb.mxu2 %v1169_v2  ;;  %287 = vmatpush.bf16.msrb.mxu1 %v1165_v4  ;;  %v194_v20 = vpack.c.bf16 %v187_v18, %v186_v17  ;;  %v170_v26 = vld [vmem:[%s1389_s19] sm:$0xff]  ;;  %v171_v27 = vld [vmem:[%s1389_s19 + $0x10] sm:$0xff]  ;;  %v475_v34 = vpack.c.bf16 %v188_v7, %v187_v18 }
  0x1d   : > { %436 = vmatpush.bf16.msrb.mxu3 %v1171_v3  ;;  %514 = vmatpush.bf16.msrb.mxu0 %v1173_v5  ;;  %v310_v28 = vld [vmem:[%s1389_s19 + $0x2] sm:$0xff]  ;;  %v311_v29 = vld [vmem:[%s1389_s19 + $0x12] sm:$0xff]  ;;  %v178_v31 = vpack.c.bf16 %v171_v27, %v170_v26 }
  0x1e   : > { %985 = vmatmul.msk.bf16.vlgmr.msra.gmra.mxu2 %vm215_vm0, %v1418_v15  ;;  %986 = vmatmul.msk.bf16.vlgmr.msra.gmra.mxu3 %vm215_vm0, %v1422_v16  ;;  %v1016_v30 = vld [vmem:[%s1389_s19 + $0x20] sm:$0xff]  ;;  %v318_v32 = vpack.c.bf16 %v311_v29, %v310_v28  ;;  %v1178_v36 = vld [vmem:[%s1660_s1 + $0x70] sm:$0xff] }
  0x1f   : > { %983 = vmatmul.msk.bf16.vlgmr.msra.gmra.mxu0 %vm215_vm0, %v194_v20  ;;  %v397_v33 = vpack.c.bf16 %v1016_v30, %v171_v27  ;;  %v1174_v37 = vld [vmem:[%s1660_s1 + $0x50] sm:$0xff]  ;;  %v1180_v38 = vld [vmem:[%s1660_s1 + $0x80] sm:$0xff] }
  0x20   : > { %358 = vmatpush.bf16.msrb.mxu2 %v1168_v6  ;;  %288 = vmatpush.bf16.msrb.mxu1 %v1164_v19  ;;  %v173_v39 = vld [vmem:[%s1389_s19 + $0x30] sm:$0xff]  ;;  %v312_v40 = vld [vmem:[%s1389_s19 + $0x22] sm:$0xff] }
  0x21   : > { %437 = vmatpush.bf16.msrb.mxu3 %v1170_v10  ;;  %515 = vmatpush.bf16.msrb.mxu0 %v1172_v21  ;;  %v313_v41 = vld [vmem:[%s1389_s19 + $0x32] sm:$0xff]  ;;  %v1018_v42 = vld [vmem:[%s1389_s19 + $0x40] sm:$0xff]  ;;  %v179_v43 = vpack.c.bf16 %v173_v39, %v1016_v30  ;;  %v553_v0 = vpack.c.bf16 %v312_v40, %v311_v29 }
  0x22   : > { %v319_v44 = vpack.c.bf16 %v313_v41, %v312_v40  ;;  %v398_v45 = vpack.c.bf16 %v1018_v42, %v173_v39  ;;  %v175_v47 = vld [vmem:[%s1389_s19 + $0x50] sm:$0xff]  ;;  %v314_v48 = vld [vmem:[%s1389_s19 + $0x42] sm:$0xff] }
  0x23   : > { %v315_v49 = vld [vmem:[%s1389_s19 + $0x52] sm:$0xff]  ;;  %v1020_v50 = vld [vmem:[%s1389_s19 + $0x60] sm:$0xff]  ;;  %v180_v51 = vpack.c.bf16 %v175_v47, %v1018_v42  ;;  %v554_v1 = vpack.c.bf16 %v314_v48, %v313_v41 }
  0x24   : > { %671 = vmatpush.bf16.msra.mxu2 %v1177_v22  ;;  %592 = vmatpush.bf16.msra.mxu1 %v1175_v24  ;;  %v320_v52 = vpack.c.bf16 %v315_v49, %v314_v48  ;;  %v399_v53 = vpack.c.bf16 %v1020_v50, %v175_v47  ;;  %v177_v55 = vld [vmem:[%s1389_s19 + $0x70] sm:$0xff]  ;;  %v316_v56 = vld [vmem:[%s1389_s19 + $0x62] sm:$0xff] }
  0x25   : > { %749 = vmatpush.bf16.msra.mxu3 %v1179_v23  ;;  %827 = vmatpush.bf16.msra.mxu0 %v1181_v25  ;;  %v317_v57 = vld [vmem:[%s1389_s19 + $0x72] sm:$0xff]  ;;  %v1022_v58 = vld [vmem:[%s1389_s19 + $0x80] sm:$0xff]  ;;  %v181_v60 = vpack.c.bf16 %v177_v55, %v1020_v50  ;;  %v555_v2 = vpack.c.bf16 %v316_v56, %v315_v49 }
  0x26   : > { %v1046_v59 = vld [vmem:[%s1389_s19 + $0x81] sm:$0xff]  ;;  %v321_v61 = vpack.c.bf16 %v317_v57, %v316_v56  ;;  %v400_v62 = vpack.c.bf16 %v1022_v58, %v177_v55  ;;  %v1094_v4 = vld [vmem:[%s1389_s19 + $0x90] sm:$0xff] }
  0x27   : > { %v478_v63 = vpack.c.bf16 %v1046_v59, %v1414_v14  ;;  %v1070_v3 = vld [vmem:[%s1389_s19 + $0x82] sm:$0xff]  ;;  %v1118_v5 = vld [vmem:[%s1389_s19 + $0x91] sm:$0xff]  ;;  %v635_v9 = vpack.c.bf16 %v1094_v4, %v1022_v58 }
  0x28   : > { %672 = vmatpush.bf16.msra.mxu2 %v1176_v35  ;;  %593 = vmatpush.bf16.msra.mxu1 %v1174_v37  ;;  %v1142_v6 = vld [vmem:[%s1389_s19 + $0x92] sm:$0xff]  ;;  %v556_v7 = vpack.c.bf16 %v1070_v3, %v317_v57  ;;  %v713_v10 = vpack.c.bf16 %v1118_v5, %v1046_v59  ;;  %s161_s19 = sand.u32 1, %s1286_s13  }
  0x29   : > { %750 = vmatpush.bf16.msra.mxu3 %v1178_v36  ;;  %828 = vmatpush.bf16.msra.mxu0 %v1180_v38  ;;  %s969_s5 = sshll.u32 %s161_s19, 6  ;;  %s888_s16 = scalar_lea.sflag [#allocation3], %s161_s19 }
  0x2a   : > { %s1579_s6 = scalar_lea.vmem [#allocation2], %s969_s5 }
  0x2b   : > { %995 = vmatmul.msk.bf16.vlgmr.msrb.gmra.mxu1 %vm215_vm0, %v178_v31  ;;  %s900_s11 = sshll.u32 %s1579_s6, 4  ;;  %s901_s11 = int_to_ptr.vmem [resolvable:$true] %s900_s11 }
  0x2e   : > { %1011 = vmatmul.msk.bf16.vlgmr.msrb.gmra.mxu2 %vm215_vm0, %v318_v32  ;;  %1035 = vmatmul.msk.bf16.vlgmr.msrb.gmra.mxu3 %vm215_vm0, %v397_v33 }
  0x2f   : > { %1059 = vmatmul.msk.bf16.vlgmr.msrb.gmra.mxu0 %vm215_vm0, %v475_v34 }
  0x3b   : > { %996 = vmatmul.msk.bf16.gmra.mxu1 %vm215_vm0, %v179_v43 }
  0x3e   : > { %1012 = vmatmul.msk.bf16.gmra.mxu2 %vm215_vm0, %v319_v44  ;;  %1036 = vmatmul.msk.bf16.gmra.mxu3 %vm215_vm0, %v398_v45 }
  0x3f   : > { %1060 = vmatmul.msk.bf16.gmra.mxu0 %vm215_vm0, %v476_v46 }
  0x4b   : > { %997 = vmatmul.msk.bf16.gmra.mxu1 %vm215_vm0, %v180_v51 }
  0x4e   : > { %1013 = vmatmul.msk.bf16.gmra.mxu2 %vm215_vm0, %v320_v52  ;;  %1037 = vmatmul.msk.bf16.gmra.mxu3 %vm215_vm0, %v399_v53 }
  0x4f   : > { %1061 = vmatmul.msk.bf16.gmra.mxu0 %vm215_vm0, %v477_v54 }
  0x5b   : > { %998 = vmatmul.msk.bf16.gmra.mxu1 %vm215_vm0, %v181_v60 }
  0x5e   : > { %1014 = vmatmul.msk.bf16.gmra.mxu2 %vm215_vm0, %v321_v61  ;;  %1038 = vmatmul.msk.bf16.gmra.mxu3 %vm215_vm0, %v400_v62 }
  0x5f   : > { %1062 = vmatmul.msk.bf16.gmra.mxu0 %vm215_vm0, %v478_v63 }
  0x6b   : > { %1083 = vmatmul.msk.bf16.vlgmr.msra.gmra.mxu1 %vm215_vm0, %v553_v0 }
  0x6e   : > { %1107 = vmatmul.msk.bf16.vlgmr.msra.gmra.mxu2 %vm215_vm0, %v179_v43  ;;  %1131 = vmatmul.msk.bf16.vlgmr.msra.gmra.mxu3 %vm215_vm0, %v1405_v11  ;;  %v791_v11 = vpack.c.bf16 %v1142_v6, %v1070_v3  ;;  %v1573_v3 = vld [vmem:[%s1661_s2] ss:$0 sm:$0xff] }
  0x6f   : > { %1155 = vmatmul.msk.bf16.vlgmr.msra.gmra.mxu0 %vm215_vm0, %v319_v44 }
  0x7b   : > { %1084 = vmatmul.msk.bf16.gmra.mxu1 %vm215_vm0, %v554_v1 }
  0x7e   : > { %1108 = vmatmul.msk.bf16.gmra.mxu2 %vm215_vm0, %v180_v51  ;;  %1132 = vmatmul.msk.bf16.gmra.mxu3 %vm215_vm0, %v1418_v15 }
  0x7f   : > { %1156 = vmatmul.msk.bf16.gmra.mxu0 %vm215_vm0, %v320_v52 }
  0x8b   : > { %1085 = vmatmul.msk.bf16.gmra.mxu1 %vm215_vm0, %v555_v2 }
  0x8e   : > { %1109 = vmatmul.msk.bf16.gmra.mxu2 %vm215_vm0, %v181_v60  ;;  %1133 = vmatmul.msk.bf16.gmra.mxu3 %vm215_vm0, %v1422_v16 }
  0x8f   : > { %1157 = vmatmul.msk.bf16.gmra.mxu0 %vm215_vm0, %v321_v61 }
  0x98   : > { %v242_v8 = vpop.f32.mrf.mxu1 }
  0x9b   : > { %1086 = vmatmul.msk.bf16.gmra.mxu1 %vm215_vm0, %v556_v7 }
  0x9c   : > { %v237_v12 = vpop.f32.mrf.mxu0 }
  0x9e   : > { %1110 = vmatmul.msk.bf16.gmra.mxu2 %vm215_vm0, %v635_v9  ;;  %1134 = vmatmul.msk.bf16.gmra.mxu3 %vm215_vm0, %v713_v10 }
  0x9f   : > { %1158 = vmatmul.msk.bf16.gmra.mxu0 %vm215_vm0, %v791_v11 }
  0xa0   : > { %v1529_v15 = vpop.f32.mrf.mxu1 }
  0xa1   : > { %v1525_v13 = vpop.f32.mrf.mxu2  ;;  %v1527_v14 = vpop.f32.mrf.mxu3 }
  0xa4   : > { %v239_v16 = vpop.f32.mrf.mxu0 }
  0xa8   : > { %v290_v19 = vpop.f32.mrf.mxu1 }
  0xa9   : > { %v1531_v17 = vpop.f32.mrf.mxu2  ;;  %v1533_v18 = vpop.f32.mrf.mxu3  ;;  %v291_v48 = vadd.f32 %v290_v19, %v237_v12 }
  0xac   : > { %v517_v20 = vpop.f32.mrf.mxu0 }
  0xb0   : > { %v292_v23 = vpop.f32.mrf.mxu1 }
  0xb1   : > { %v360_v21 = vpop.f32.mrf.mxu2  ;;  %v439_v22 = vpop.f32.mrf.mxu3  ;;  %v293_v55 = vadd.f32 %v292_v23, %v239_v16 }
  0xb2   : > { %v380_v50 = vadd.f32 %v360_v21, %v291_v48 }
  0xb4   : > { %v519_v24 = vpop.f32.mrf.mxu0  ;;  %v459_v53 = vadd.f32 %v439_v22, %v380_v50 }
  0xb6   : > { %v537_v58 = vadd.f32 %v517_v20, %v459_v53 }
  0xb8   : > { %v295_v27 = vpop.f32.mrf.mxu1 }
  0xb9   : > { %v362_v25 = vpop.f32.mrf.mxu2  ;;  %v441_v26 = vpop.f32.mrf.mxu3  ;;  %v296_v1 = vadd.f32 %v295_v27, %v242_v8 }
  0xba   : > { %v381_v57 = vadd.f32 %v362_v25, %v293_v55 }
  0xbc   : > { %v522_v28 = vpop.f32.mrf.mxu0  ;;  %v460_v62 = vadd.f32 %v441_v26, %v381_v57 }
  0xbe   : > { %v538_v7 = vadd.f32 %v519_v24, %v460_v62 }
  0xc0   : > { %v297_v31 = vpop.f32.mrf.mxu1 }
  0xc1   : > { %v365_v29 = vpop.f32.mrf.mxu2  ;;  %v444_v30 = vpop.f32.mrf.mxu3  ;;  %v298_v21 = vadd.f32 %v297_v31, %v1529_v15 }
  0xc2   : > { %v382_v5 = vadd.f32 %v365_v29, %v296_v1 }
  0xc4   : > { %v1535_v32 = vpop.f32.mrf.mxu0  ;;  %v461_v16 = vadd.f32 %v444_v30, %v382_v5 }
  0xc6   : > { %v539_v26 = vadd.f32 %v522_v28, %v461_v16 }
  0xc8   : > { %v1537_v35 = vpop.f32.mrf.mxu1 }
  0xc9   : > { %v367_v33 = vpop.f32.mrf.mxu2  ;;  %v446_v34 = vpop.f32.mrf.mxu3  ;;  %v301_v31 = vadd.f32 %v1537_v35, %v1525_v13 }
  0xca   : > { %v383_v24 = vadd.f32 %v367_v33, %v298_v21 }
  0xcc   : > { %v1539_v36 = vpop.f32.mrf.mxu0  ;;  %v462_v50 = vadd.f32 %v446_v34, %v383_v24 }
  0xce   : > { %v540_v57 = vadd.f32 %v1535_v32, %v462_v50 }
  0xd0   : > { %v1545_v39 = vpop.f32.mrf.mxu1 }
  0xd1   : > { %v1541_v37 = vpop.f32.mrf.mxu2  ;;  %v1543_v38 = vpop.f32.mrf.mxu3  ;;  %v303_v35 = vadd.f32 %v1545_v39, %v1531_v17 }
  0xd2   : > { %v384_v33 = vadd.f32 %v1541_v37, %v301_v31 }
  0xd4   : > { %v1547_v40 = vpop.f32.mrf.mxu0 }
  0xd8   : > { %v1553_v43 = vpop.f32.mrf.mxu1 }
  0xd9   : > { %v1549_v41 = vpop.f32.mrf.mxu2  ;;  %v1551_v42 = vpop.f32.mrf.mxu3  ;;  %v306_v39 = vadd.f32 %v1553_v43, %v1527_v14 }
  0xdc   : > { %v1555_v44 = vpop.f32.mrf.mxu0 }
  0xe0   : > { %v1561_v47 = vpop.f32.mrf.mxu1 }
  0xe1   : > { %v1557_v45 = vpop.f32.mrf.mxu2  ;;  %v1559_v46 = vpop.f32.mrf.mxu3  ;;  %v308_v43 = vadd.f32 %v1561_v47, %v1533_v18 }
  0xe4   : > { %v1563_v49 = vpop.f32.mrf.mxu0 }
  0xe8   : > { %v595_v54 = vpop.f32.mrf.mxu1 }
  0xe9   : > { %v1565_v51 = vpop.f32.mrf.mxu2  ;;  %v1567_v52 = vpop.f32.mrf.mxu3  ;;  %v615_v59 = vadd.f32 %v595_v54, %v537_v58 }
  0xec   : > { %v830_v56 = vpop.f32.mrf.mxu0 }
  0xf0   : > { %v597_v0 = vpop.f32.mrf.mxu1 }
  0xf1   : > { %v674_v60 = vpop.f32.mrf.mxu2  ;;  %v752_v61 = vpop.f32.mrf.mxu3  ;;  %v616_v10 = vadd.f32 %v597_v0, %v538_v7  ;;  %v385_v0 = vadd.f32 %v1549_v41, %v303_v35 }
  0xf2   : > { %v694_v63 = vadd.f32 %v674_v60, %v615_v59 }
  0xf3   : > { %v464_v7 = vadd.f32 %v1551_v42, %v385_v0 }
  0xf4   : > { %v772_v2 = vadd.f32 %v752_v61, %v694_v63  ;;  %v832_v4 = vpop.f32.mrf.mxu0  ;;  %v463_v61 = vadd.f32 %v1543_v38, %v384_v33 }
  0xf6   : > { %v850_v6 = vadd.f32 %v830_v56, %v772_v2  ;;  %v541_v1 = vadd.f32 %v1539_v36, %v463_v61  ;;  %v386_v36 = vadd.f32 %v1557_v45, %v306_v39 }
  0xf8   : > { %v862_v9 = vadd.f32 %v1573_v3, %v850_v6  ;;  %v600_v20 = vpop.f32.mrf.mxu1  ;;  %v465_v21 = vadd.f32 %v1559_v46, %v386_v36 }
  0xf9   : > { %v676_v11 = vpop.f32.mrf.mxu2  ;;  %v754_v12 = vpop.f32.mrf.mxu3  ;;  %v617_v29 = vadd.f32 %v600_v20, %v539_v26 }
  0xfa   : > { %v870_v8 = vmax.f32 %v862_v9, 0.0  ;;  %v695_v19 = vadd.f32 %v676_v11, %v616_v10 }
  0xfc   : > { %879 = vst.msk [vmem:[%s1579_s6] sm:$0xff] %vm878_vm1, %v870_v8  ;;  %v773_v22 = vadd.f32 %v754_v12, %v695_v19  ;;  %v835_v23 = vpop.f32.mrf.mxu0  ;;  %v542_v12 = vadd.f32 %v1547_v40, %v464_v7  ;;  %v387_v40 = vadd.f32 %v1565_v51, %v308_v43 }
  0xfe   : > { %v851_v25 = vadd.f32 %v832_v4, %v773_v22 }
 0x100   : > { %v863_v27 = vadd.f32 %v1573_v3, %v851_v25  ;;  %v602_v15 = vpop.f32.mrf.mxu1  ;;  %v543_v25 = vadd.f32 %v1555_v44, %v465_v21 }
 0x101   : > { %v679_v30 = vpop.f32.mrf.mxu2  ;;  %v757_v48 = vpop.f32.mrf.mxu3  ;;  %v618_v59 = vadd.f32 %v602_v15, %v540_v57 }
 0x102   : > { %v871_v53 = vmax.f32 %v863_v27, 0.0  ;;  %v696_v54 = vadd.f32 %v679_v30, %v617_v29  ;;  %v466_v30 = vadd.f32 %v1567_v52, %v387_v40 }
 0x104   : > { %880 = vst.msk [vmem:[%s1579_s6 + $0x8] sm:$0xff] %vm878_vm1, %v871_v53  ;;  %v774_v55 = vadd.f32 %v757_v48, %v696_v54  ;;  %v837_v56 = vpop.f32.mrf.mxu0  ;;  %v544_v44 = vadd.f32 %v1563_v49, %v466_v30 }
 0x106   : > { %v852_v28 = vadd.f32 %v835_v23, %v774_v55 }
 0x108   : > { %v864_v58 = vadd.f32 %v1573_v3, %v852_v28  ;;  %v605_v13 = vpop.f32.mrf.mxu1 }
 0x109   : > { %v681_v34 = vpop.f32.mrf.mxu2  ;;  %v759_v60 = vpop.f32.mrf.mxu3  ;;  %v619_v5 = vadd.f32 %v605_v13, %v541_v1 }
 0x10a   : > { %v872_v62 = vmax.f32 %v864_v58, 0.0  ;;  %v697_v63 = vadd.f32 %v681_v34, %v618_v59 }
 0x10c   : > { %881 = vst.msk [vmem:[%s1579_s6 + $0x10] sm:$0xff] %vm878_vm1, %v872_v62  ;;  %v775_v37 = vadd.f32 %v759_v60, %v697_v63  ;;  %v840_v2 = vpop.f32.mrf.mxu0 }
 0x10e   : > { %v853_v32 = vadd.f32 %v837_v56, %v775_v37 }
 0x110   : > { %v865_v4 = vadd.f32 %v1573_v3, %v853_v32  ;;  %v607_v17 = vpop.f32.mrf.mxu1 }
 0x111   : > { %v684_v38 = vpop.f32.mrf.mxu2  ;;  %v762_v6 = vpop.f32.mrf.mxu3  ;;  %v620_v8 = vadd.f32 %v607_v17, %v542_v12 }
 0x112   : > { %v873_v9 = vmax.f32 %v865_v4, 0.0  ;;  %v698_v10 = vadd.f32 %v684_v38, %v619_v5 }
 0x114   : > { %882 = vst.msk [vmem:[%s1579_s6 + $0x18] sm:$0xff] %vm878_vm1, %v873_v9  ;;  %v776_v41 = vadd.f32 %v762_v6, %v698_v10  ;;  %v842_v19 = vpop.f32.mrf.mxu0 }
 0x116   : > { %v854_v11 = vadd.f32 %v840_v2, %v776_v41 }
 0x118   : > { %v866_v16 = vadd.f32 %v1573_v3, %v854_v11  ;;  %v610_v14 = vpop.f32.mrf.mxu1 }
 0x119   : > { %v686_v42 = vpop.f32.mrf.mxu2  ;;  %v764_v20 = vpop.f32.mrf.mxu3  ;;  %v621_v27 = vadd.f32 %v610_v14, %v543_v25 }
 0x11a   : > { %v874_v22 = vmax.f32 %v866_v16, 0.0  ;;  %v699_v23 = vadd.f32 %v686_v42, %v620_v8 }
 0x11c   : > { %883 = vst.msk [vmem:[%s1579_s6 + $0x20] sm:$0xff] %vm878_vm1, %v874_v22  ;;  %v777_v45 = vadd.f32 %v764_v20, %v699_v23  ;;  %v845_v18 = vpop.f32.mrf.mxu0 }
 0x11e   : > { %v855_v24 = vadd.f32 %v842_v19, %v777_v45 }
 0x120   : > { %v867_v26 = vadd.f32 %v1573_v3, %v855_v24  ;;  %v612_v51 = vpop.f32.mrf.mxu1 }
 0x121   : > { %v689_v46 = vpop.f32.mrf.mxu2  ;;  %v767_v29 = vpop.f32.mrf.mxu3  ;;  %v622_v15 = vadd.f32 %v612_v51, %v544_v44 }
 0x122   : > { %v875_v48 = vmax.f32 %v867_v26, 0.0  ;;  %v700_v50 = vadd.f32 %v689_v46, %v621_v27 }
 0x124   : > { %884 = vst.msk [vmem:[%s1579_s6 + $0x28] sm:$0xff] %vm878_vm1, %v875_v48  ;;  %v778_v47 = vadd.f32 %v767_v29, %v700_v50  ;;  %v847_v28 = vpop.f32.mrf.mxu0 }
 0x126   : > { %v856_v53 = vadd.f32 %v845_v18, %v778_v47 }
 0x128   : > { %v868_v54 = vadd.f32 %v1573_v3, %v856_v53 }
 0x129   : > { %v691_v31 = vpop.f32.mrf.mxu2  ;;  %v769_v56 = vpop.f32.mrf.mxu3 }
 0x12a   : > { %v876_v52 = vmax.f32 %v868_v54, 0.0  ;;  %v701_v55 = vadd.f32 %v691_v31, %v622_v15 }
 0x12c   : > { %885 = vst.msk [vmem:[%s1579_s6 + $0x30] sm:$0xff] %vm878_vm1, %v876_v52  ;;  %v779_v33 = vadd.f32 %v769_v56, %v701_v55 }
 0x12e   : > { %v857_v49 = vadd.f32 %v847_v28, %v779_v33 }
 0x130   : > { %v869_v57 = vadd.f32 %v1573_v3, %v857_v49 }
 0x132   : > { %v877_v58 = vmax.f32 %v869_v57, 0.0 }
 0x134   : > { %886 = vst.msk [vmem:[%s1579_s6 + $0x38] sm:$0xff] %vm878_vm1, %v877_v58 }
 0x135   : > { %1259 = shalt.err (!%p1256_p3)
}
 0x136   : > { %s1296_s19 = smov 128   ;;  %s1297_s30 = smov 8  }
 0x137   : > { %1190 = dma.vmem_to_hbm [thread:$0]  (%p1356_p5), %s901_s11, 1024, %s903_s17, %s888_s16, %s1296_s19, %s1296_s19, %s1297_s30  }
 0x138 PF: > { %p1196_p4 = scmp.ge.s32.totalorder %s1294_s15, 2  ;;  %s917_s4 = sand.u32 1, %s1282_s12  }
 0x139   : > { %s918_s5 = scalar_lea.sflag [#allocation3], %s917_s4 }
 0x13a   : > { %p1193_p7 = pnand %p1196_p4, %p1360_p6 }
 0x13c   : > { %p1194_p8 = pneg %p1193_p7 }
 0x13e   : > { %1277 = dma.done.wait (%p1194_p8), %s918_s5, 1024  }
 0x13f   : > { %1279 = vsyncadd (%p1194_p8), %s918_s5, 4294966272  ;;  %p13_p9 = scmp.ge.s32.totalorder %s1343_s18, 4   ;;  %s1665_s12 = smov %s1286_s13 }
 0x140   : > { %s1666_s13 = smov %s1290_s14  ;;  %s1667_s14 = smov %s1354_s21 }
 0x141   : > { %s1668_s15 = smov %s1343_s18  ;;  %15 = sbr.rel (!%p13_p9) target bundleno = 3 (0x3), region = 77 }
 0x146   :  { %924 = vsyncpa [#allocation3], 1 }
 0x147   :  { %926 = vsyncpa [#allocation3 + $0x1], 1 }

// kernel: encoder_forward.2
= control target key start
LH: loop header
LB: loop body
LE: loop exit
PB: predicated region body
PF: predicated region fallthrough
CT: control target
= control target key end

     0   :  { %s2708_s12 = smov 0   ;;  %s3513_s0 = inlined_call_operand.vmem [shape: f32[2,18,18,4], index: 0, kind: input, shape index: {}]   ;;  %s3514_s1 = inlined_call_operand.vmem [shape: bf16[9,4,32], index: 1, kind: input, shape index: {}]   ;;  %s3515_s2 = inlined_call_operand.vmem [shape: f32[1,32], index: 2, kind: input, shape index: {}]   ;;  %s3516_s3 = inlined_call_operand.vmem [shape: f32[2,8,8,32], index: 3, kind: output, shape index: {}]  }
   0x1 LB: > { %s2312_s13 = sadd.s32 4294967295, %s2686_s12   ;;  %p2316_p0 = scmp.ge.s32.totalorder %s2686_s12, 1  ;;  %s2686_s12 = sphi %s2708_s12, %s13_s12  }
   0x2   : > { %p137_p1 = scmp.lt.s32.totalorder %s2686_s12, 3 }
   0x4   : > { %p138_p2 = pnand %p2316_p0, %p137_p1 }
   0x6   : > { %141 = sbr.rel (%p138_p2) target bundleno = 744 (0x2e8), region = 32 }
   0xb   : > { %v2320_v0 = vld [vmem:[%s3514_s1 + $0x2] sm:$0x3]  ;;  %vm320_vm0 = vcmask 1041408   ;;  %p161_p3 = scmp.lt.s32.totalorder %s2312_s13, 1  ;;  %v2353_v2 = vld [vmem:[%s3514_s1 + $0x4] sm:$0x3] }
   0xc   : > { %v322_v1 = vsel %vm320_vm0, %v2320_v0, 0  ;;  %v2402_v3 = vld [vmem:[%s3514_s1 + $0x6] sm:$0x3]  ;;  %v652_v4 = vsel %vm320_vm0, %v2353_v2, 0  ;;  %v220_v6 = vld [vmem:[%s3514_s1] sm:$0x3] }
   0xd   : > { %2667 = vmatpush.bf16.msra.mxu1 %v322_v1  ;;  %2668 = vmatpush.bf16.msra.mxu2 %v322_v1  ;;  %s3560_s13 = smov (!%p161_p3, %s2312_s13), 1  ;;  %v875_v5 = vsel %vm320_vm0, %v2402_v3, 0  ;;  %v462_v7 = vsel %vm320_vm0, %v220_v6, 0  ;;  %v2451_v8 = vld [vmem:[%s3514_s1 + $0x8] sm:$0x3]  ;;  %vm271_vm1 = vcmask 31744  }
   0xe   : > { %2669 = vmatpush.bf16.msra.mxu3 %v322_v1  ;;  %331 = vmatpush.bf16.msra.mxu0 %v322_v1  ;;  %s2670_s24 = smul.u32 432, %s3560_s13  ;;  %v1097_v9 = vsel %vm320_vm0, %v2451_v8, 0  ;;  %v2549_v46 = vld [vmem:[%s3514_s1 + $0xc] sm:$0x3]  ;;  %v2598_v48 = vld [vmem:[%s3514_s1 + $0xe] sm:$0x3] }
   0xf   : > { %v1542_v47 = vsel %vm320_vm0, %v2549_v46, 0  ;;  %v2500_v49 = vld [vmem:[%s3514_s1 + $0xa] sm:$0x3]  ;;  %v1764_v50 = vsel %vm320_vm0, %v2598_v48, 0  ;;  %v2647_v52 = vld [vmem:[%s3514_s1 + $0x10] sm:$0x3] }
  0x10   : > { %s2742_s27 = scalar_lea.vmem %s3513_s0, %s2670_s24  ;;  %v1319_v51 = vsel %vm320_vm0, %v2500_v49, 0  ;;  %v1986_v53 = vsel %vm320_vm0, %v2647_v52, 0  ;;  %vm2193_vm2 = vcmask 261120   ;;  %s2666_s11 = sshll.u32 %s3560_s13, 6 }
  0x11   : > { %661 = vmatpush.bf16.msrb.mxu2 %v652_v4  ;;  %471 = vmatpush.bf16.msrb.mxu1 %v462_v7  ;;  %v229_v10 = vld [vmem:[%s2742_s27 + $0x61] sm:$0xff]  ;;  %v230_v11 = vld [vmem:[%s2742_s27 + $0x69] sm:$0xff]  ;;  %v231_v22 = vld [vmem:[%s2742_s27 + $0x79] sm:$0xff]  ;;  %s3376_s16 = scalar_lea.vmem %s3516_s3, %s2666_s11 }
  0x12   : > { %884 = vmatpush.bf16.msrb.mxu3 %v875_v5  ;;  %1106 = vmatpush.bf16.msrb.mxu0 %v1097_v9  ;;  %v237_v12 = vld [vmem:[%s2742_s27 + $0xc1] sm:$0xff]  ;;  %v2747_v13 = vpack.c.bf16 %v230_v11, %v229_v10  ;;  %v238_v14 = vld [vmem:[%s2742_s27 + $0xc9] sm:$0xff]  ;;  %v239_v24 = vld [vmem:[%s2742_s27 + $0xd9] sm:$0xff] }
  0x13   : > { %v245_v15 = vld [vmem:[%s2742_s27 + $0x121] sm:$0xff]  ;;  %v246_v16 = vld [vmem:[%s2742_s27 + $0x129] sm:$0xff]  ;;  %v2752_v17 = vpack.c.bf16 %v238_v14, %v237_v12  ;;  %v247_v26 = vld [vmem:[%s2742_s27 + $0x139] sm:$0xff] }
  0x14   : > { %v2754_v18 = vpack.c.bf16 %v246_v16, %v245_v15  ;;  %v221_v19 = vld [vmem:[%s2742_s27 + $0x1] sm:$0xff]  ;;  %v222_v20 = vld [vmem:[%s2742_s27 + $0x9] sm:$0xff]  ;;  %2325 = vmatmul.msk.bf16.vlgmr.msra.gmra.mxu1 %vm271_vm1, %v2747_v13  ;;  %v223_v28 = vld [vmem:[%s2742_s27 + $0x19] sm:$0xff] }
  0x15   : > { %v253_v21 = vpack.c.bf16 %v222_v20, %v221_v19  ;;  %2329 = vmatmul.msk.bf16.vlgmr.msra.gmra.mxu2 %vm271_vm1, %v2752_v17  ;;  %v232_v23 = vld [vmem:[%s2742_s27 + $0x81] sm:$0xff]  ;;  %v233_v34 = vld [vmem:[%s2742_s27 + $0x91] sm:$0xff]  ;;  %v234_v35 = vld [vmem:[%s2742_s27 + $0x99] sm:$0xff]  ;;  %1328 = vmatpush.bf16.msra.mxu1 %v1319_v51 }
  0x16   : > { %2333 = vmatmul.msk.bf16.vlgmr.msra.gmra.mxu3 %vm271_vm1, %v2754_v18  ;;  %v240_v25 = vld [vmem:[%s2742_s27 + $0xe1] sm:$0xff]  ;;  %v2773_v30 = vpack.c.bf16 %v232_v23, %v231_v22  ;;  %v241_v36 = vld [vmem:[%s2742_s27 + $0xf1] sm:$0xff]  ;;  %v242_v37 = vld [vmem:[%s2742_s27 + $0xf9] sm:$0xff]  ;;  %v2794_v42 = vpack.c.bf16 %v234_v35, %v233_v34  ;;  %1551 = vmatpush.bf16.msra.mxu2 %v1542_v47 }
  0x17   : > { %2321 = vmatmul.msk.bf16.vlgmr.msra.gmra.mxu0 %vm271_vm1, %v253_v21  ;;  %v248_v27 = vld [vmem:[%s2742_s27 + $0x141] sm:$0xff]  ;;  %v2775_v31 = vpack.c.bf16 %v240_v25, %v239_v24  ;;  %v249_v38 = vld [vmem:[%s2742_s27 + $0x151] sm:$0xff]  ;;  %v250_v39 = vld [vmem:[%s2742_s27 + $0x159] sm:$0xff]  ;;  %v2796_v43 = vpack.c.bf16 %v242_v37, %v241_v36  ;;  %1773 = vmatpush.bf16.msra.mxu3 %v1764_v50 }
  0x18   : > { %v224_v29 = vld [vmem:[%s2742_s27 + $0x21] sm:$0xff]  ;;  %v2777_v32 = vpack.c.bf16 %v248_v27, %v247_v26  ;;  %v225_v40 = vld [vmem:[%s2742_s27 + $0x31] sm:$0xff]  ;;  %v226_v41 = vld [vmem:[%s2742_s27 + $0x39] sm:$0xff]  ;;  %v2798_v44 = vpack.c.bf16 %v250_v39, %v249_v38  ;;  %1995 = vmatpush.bf16.msra.mxu0 %v1986_v53 }
  0x19   : > { %v254_v33 = vpack.c.bf16 %v224_v29, %v223_v28  ;;  %v2800_v45 = vpack.c.bf16 %v226_v41, %v225_v40  ;;  %v235_v54 = vld [vmem:[%s2742_s27 + $0xa9] sm:$0xff]  ;;  %v236_v55 = vld [vmem:[%s2742_s27 + $0xb1] sm:$0xff]  ;;  %v172_v2 = vld [vmem:[%s2742_s27] sm:$0xff] }
  0x1a   : > { %v243_v56 = vld [vmem:[%s2742_s27 + $0x109] sm:$0xff]  ;;  %v244_v57 = vld [vmem:[%s2742_s27 + $0x111] sm:$0xff]  ;;  %v2834_v62 = vpack.c.bf16 %v236_v55, %v235_v54  ;;  %v2371_v7 = vld [vmem:[%s2742_s27 + $0x20] sm:$0xff] }
  0x1b   : > { %v251_v58 = vld [vmem:[%s2742_s27 + $0x169] sm:$0xff]  ;;  %v252_v59 = vld [vmem:[%s2742_s27 + $0x171] sm:$0xff]  ;;  %v2836_v63 = vpack.c.bf16 %v244_v57, %v243_v56  ;;  %v555_v11 = vld [vmem:[%s2742_s27 + $0x1a] sm:$0xff] }
  0x1c   : > { %v227_v60 = vld [vmem:[%s2742_s27 + $0x49] sm:$0xff]  ;;  %v228_v61 = vld [vmem:[%s2742_s27 + $0x51] sm:$0xff]  ;;  %v2838_v0 = vpack.c.bf16 %v252_v59, %v251_v58  ;;  %v558_v21 = vld [vmem:[%s2742_s27 + $0x3a] sm:$0xff] }
  0x1d   : > { %v2840_v1 = vpack.c.bf16 %v228_v61, %v227_v60  ;;  %v173_v3 = vld [vmem:[%s2742_s27 + $0x8] sm:$0xff]  ;;  %v2370_v6 = vld [vmem:[%s2742_s27 + $0x18] sm:$0xff]  ;;  %v2372_v14 = vld [vmem:[%s2742_s27 + $0x30] sm:$0xff] }
  0x1e   : > { %v553_v4 = vld [vmem:[%s2742_s27 + $0x2] sm:$0xff]  ;;  %v554_v5 = vld [vmem:[%s2742_s27 + $0xa] sm:$0xff]  ;;  %v204_v8 = vpack.c.bf16 %v173_v3, %v172_v2  ;;  %v808_v10 = vpack.c.bf16 %v2371_v7, %v2370_v6  ;;  %v2373_v15 = vld [vmem:[%s2742_s27 + $0x38] sm:$0xff] }
  0x1f   : > { %v585_v9 = vpack.c.bf16 %v554_v5, %v553_v4  ;;  %v556_v12 = vld [vmem:[%s2742_s27 + $0x22] sm:$0xff]  ;;  %v2866_v19 = vpack.c.bf16 %v2373_v15, %v2372_v14  ;;  %v557_v20 = vld [vmem:[%s2742_s27 + $0x32] sm:$0xff]  ;;  %v559_v26 = vld [vmem:[%s2742_s27 + $0x4a] sm:$0xff] }
  0x20   : > { %v2864_v16 = vpack.c.bf16 %v556_v12, %v555_v11  ;;  %v2374_v22 = vld [vmem:[%s2742_s27 + $0x48] sm:$0xff]  ;;  %v2375_v23 = vld [vmem:[%s2742_s27 + $0x50] sm:$0xff]  ;;  %v2879_v24 = vpack.c.bf16 %v558_v21, %v557_v20  ;;  %v2376_v28 = vld [vmem:[%s2742_s27 + $0x60] sm:$0xff] }
  0x21   : > { %v2881_v25 = vpack.c.bf16 %v2375_v23, %v2374_v22  ;;  %v560_v27 = vld [vmem:[%s2742_s27 + $0x52] sm:$0xff]  ;;  %v2377_v29 = vld [vmem:[%s2742_s27 + $0x68] sm:$0xff]  ;;  %v2379_v38 = vld [vmem:[%s2742_s27 + $0x80] sm:$0xff] }
  0x22   : > { %v2897_v34 = vpack.c.bf16 %v2377_v29, %v2376_v28  ;;  %v561_v35 = vld [vmem:[%s2742_s27 + $0x62] sm:$0xff]  ;;  %v562_v36 = vld [vmem:[%s2742_s27 + $0x6a] sm:$0xff]  ;;  %v2378_v37 = vld [vmem:[%s2742_s27 + $0x78] sm:$0xff] }
  0x23   : > { %v2913_v40 = vpack.c.bf16 %v562_v36, %v561_v35  ;;  %v2915_v41 = vpack.c.bf16 %v2379_v38, %v2378_v37  ;;  %v563_v50 = vld [vmem:[%s2742_s27 + $0x7a] sm:$0xff]  ;;  %v564_v51 = vld [vmem:[%s2742_s27 + $0x82] sm:$0xff]  ;;  %v2380_v52 = vld [vmem:[%s2742_s27 + $0x90] sm:$0xff] }
  0x24   : > { %2326 = vmatmul.msk.bf16.gmra.mxu1 %vm271_vm1, %v2773_v30  ;;  %v2381_v53 = vld [vmem:[%s2742_s27 + $0x98] sm:$0xff]  ;;  %v2945_v56 = vpack.c.bf16 %v564_v51, %v563_v50  ;;  %v2382_v5 = vld [vmem:[%s2742_s27 + $0xa8] sm:$0xff]  ;;  %v2383_v6 = vld [vmem:[%s2742_s27 + $0xb0] sm:$0xff] }
  0x25   : > { %2330 = vmatmul.msk.bf16.gmra.mxu2 %vm271_vm1, %v2775_v31  ;;  %v2947_v57 = vpack.c.bf16 %v2381_v53, %v2380_v52  ;;  %v565_v3 = vld [vmem:[%s2742_s27 + $0x92] sm:$0xff]  ;;  %v566_v4 = vld [vmem:[%s2742_s27 + $0x9a] sm:$0xff]  ;;  %v567_v21 = vld [vmem:[%s2742_s27 + $0xaa] sm:$0xff] }
  0x26   : > { %2334 = vmatmul.msk.bf16.gmra.mxu3 %vm271_vm1, %v2777_v32  ;;  %v568_v22 = vld [vmem:[%s2742_s27 + $0xb2] sm:$0xff]  ;;  %v2384_v23 = vld [vmem:[%s2742_s27 + $0xc0] sm:$0xff]  ;;  %v570_v53 = vld [vmem:[%s2742_s27 + $0xca] sm:$0xff] }
  0x27   : > { %2322 = vmatmul.msk.bf16.gmra.mxu0 %vm271_vm1, %v254_v33  ;;  %v3009_v29 = vpack.c.bf16 %v568_v22, %v567_v21  ;;  %v569_v52 = vld [vmem:[%s2742_s27 + $0xc2] sm:$0xff] }
  0x28   : > { %v3039_v22 = vpack.c.bf16 %v570_v53, %v569_v52 }
  0x29   : > { %3529 = vst [vmem:[#allocation9_spill] sm:$0xff] %v3009_v29 }
  0x2a   : > { %3533 = vst [vmem:[#allocation13_spill] sm:$0xff] %v3039_v22 }
  0x34   : > { %2327 = vmatmul.msk.bf16.gmra.mxu1 %vm271_vm1, %v2794_v42 }
  0x35   : > { %2331 = vmatmul.msk.bf16.gmra.mxu2 %vm271_vm1, %v2796_v43 }
  0x36   : > { %2335 = vmatmul.msk.bf16.gmra.mxu3 %vm271_vm1, %v2798_v44 }
  0x37   : > { %2323 = vmatmul.msk.bf16.gmra.mxu0 %vm271_vm1, %v2800_v45 }
  0x44   : > { %2328 = vmatmul.msk.bf16.gmra.mxu1 %vm271_vm1, %v2834_v62 }
  0x45   : > { %2332 = vmatmul.msk.bf16.gmra.mxu2 %vm271_vm1, %v2836_v63 }
  0x46   : > { %2336 = vmatmul.msk.bf16.gmra.mxu3 %vm271_vm1, %v2838_v0 }
  0x47   : > { %2324 = vmatmul.msk.bf16.gmra.mxu0 %vm271_vm1, %v2840_v1 }
  0x54   : > { %2337 = vmatmul.msk.bf16.vlgmr.msrb.gmra.mxu1 %vm271_vm1, %v204_v8 }
  0x55   : > { %2354 = vmatmul.msk.bf16.vlgmr.msrb.gmra.mxu2 %vm271_vm1, %v585_v9  ;;  %v2977_v9 = vpack.c.bf16 %v566_v4, %v565_v3  ;;  %v2386_v3 = vld [vmem:[%s2742_s27 + $0xd8] sm:$0xff]  ;;  %v2387_v4 = vld [vmem:[%s2742_s27 + $0xe0] sm:$0xff] }
  0x56   : > { %2403 = vmatmul.msk.bf16.vlgmr.msrb.gmra.mxu3 %vm271_vm1, %v808_v10 }
  0x57   : > { %2452 = vmatmul.msk.bf16.vlgmr.msrb.gmra.mxu0 %vm271_vm1, %v254_v33  ;;  %v2895_v33 = vpack.c.bf16 %v560_v27, %v559_v26  ;;  %v2385_v26 = vld [vmem:[%s2742_s27 + $0xc8] sm:$0xff] }
  0x58   : > { %v3011_v35 = vpack.c.bf16 %v2385_v26, %v2384_v23 }
  0x5a   : > { %3530 = vst [vmem:[#allocation10_spill] sm:$0xff] %v3011_v35 }
  0x64   : > { %2338 = vmatmul.msk.bf16.gmra.mxu1 %vm271_vm1, %v808_v10  ;;  %v2979_v10 = vpack.c.bf16 %v2383_v6, %v2382_v5 }
  0x65   : > { %2355 = vmatmul.msk.bf16.gmra.mxu2 %vm271_vm1, %v2864_v16 }
  0x66   : > { %2404 = vmatmul.msk.bf16.gmra.mxu3 %vm271_vm1, %v2866_v19  ;;  %3526 = vst [vmem:[#allocation6_spill] sm:$0xff] %v2979_v10 }
  0x67   : > { %2453 = vmatmul.msk.bf16.gmra.mxu0 %vm271_vm1, %v2800_v45 }
  0x74   : > { %2339 = vmatmul.msk.bf16.gmra.mxu1 %vm271_vm1, %v2866_v19 }
  0x75   : > { %2356 = vmatmul.msk.bf16.gmra.mxu2 %vm271_vm1, %v2879_v24 }
  0x76   : > { %2405 = vmatmul.msk.bf16.gmra.mxu3 %vm271_vm1, %v2881_v25 }
  0x77   : > { %2454 = vmatmul.msk.bf16.gmra.mxu0 %vm271_vm1, %v2840_v1 }
  0x84   : > { %2340 = vmatmul.msk.bf16.gmra.mxu1 %vm271_vm1, %v2881_v25 }
  0x85   : > { %2357 = vmatmul.msk.bf16.gmra.mxu2 %vm271_vm1, %v2895_v33 }
  0x86   : > { %2406 = vmatmul.msk.bf16.gmra.mxu3 %vm271_vm1, %v2897_v34 }
  0x87   : > { %2455 = vmatmul.msk.bf16.gmra.mxu0 %vm271_vm1, %v2747_v13 }
  0x91   : > { %v2911_v39 = vpop.f32.mrf.mxu1 }
  0x94   : > { %v2917_v46 = vpop.f32.mrf.mxu0  ;;  %2341 = vmatmul.msk.bf16.gmra.mxu1 %vm271_vm1, %v2897_v34 }
  0x95   : > { %2358 = vmatmul.msk.bf16.gmra.mxu2 %vm271_vm1, %v2913_v40 }
  0x96   : > { %2407 = vmatmul.msk.bf16.gmra.mxu3 %vm271_vm1, %v2915_v41 }
  0x97   : > { %2456 = vmatmul.msk.bf16.gmra.mxu0 %vm271_vm1, %v2773_v30 }
  0x98   : > { %v2927_v13 = vpop.f32.mrf.mxu2 }
  0x99   : > { %v2929_v47 = vpop.f32.mrf.mxu3  ;;  %v2931_v48 = vpop.f32.mrf.mxu1 }
  0x9c   : > { %v2933_v49 = vpop.f32.mrf.mxu0 }
  0xa0   : > { %v2939_v54 = vpop.f32.mrf.mxu2 }
  0xa1   : > { %v2941_v55 = vpop.f32.mrf.mxu3  ;;  %v2943_v30 = vpop.f32.mrf.mxu1 }
  0xa2   : > { %3523 = vst [vmem:[#allocation3_spill] sm:$0xff] %v2941_v55 }
  0xa4   : > { %v2949_v58 = vpop.f32.mrf.mxu0  ;;  %2342 = vmatmul.msk.bf16.gmra.mxu1 %vm271_vm1, %v2915_v41 }
  0xa5   : > { %2359 = vmatmul.msk.bf16.gmra.mxu2 %vm271_vm1, %v2945_v56 }
  0xa6   : > { %2408 = vmatmul.msk.bf16.gmra.mxu3 %vm271_vm1, %v2947_v57 }
  0xa7   : > { %2457 = vmatmul.msk.bf16.gmra.mxu0 %vm271_vm1, %v2794_v42 }
  0xa8   : > { %v2959_v59 = vpop.f32.mrf.mxu2 }
  0xa9   : > { %v2961_v60 = vpop.f32.mrf.mxu3  ;;  %v2963_v61 = vpop.f32.mrf.mxu1 }
  0xaa   : > { %3524 = vst [vmem:[#allocation4_spill] sm:$0xff] %v2961_v60 }
  0xac   : > { %v2965_v2 = vpop.f32.mrf.mxu0 }
  0xb0   : > { %v2971_v7 = vpop.f32.mrf.mxu2 }
  0xb1   : > { %v2973_v8 = vpop.f32.mrf.mxu3  ;;  %v2975_v42 = vpop.f32.mrf.mxu1 }
  0xb2   : > { %3525 = vst [vmem:[#allocation5_spill] sm:$0xff] %v2973_v8 }
  0xb4   : > { %v2981_v11 = vpop.f32.mrf.mxu0  ;;  %2343 = vmatmul.msk.bf16.gmra.mxu1 %vm271_vm1, %v2947_v57 }
  0xb5   : > { %2360 = vmatmul.msk.bf16.gmra.mxu2 %vm271_vm1, %v2977_v9 }
  0xb6   : > { %2409 = vmatmul.msk.bf16.gmra.mxu3 %vm271_vm1, %v2979_v10 }
  0xb7   : > { %2458 = vmatmul.msk.bf16.gmra.mxu0 %vm271_vm1, %v2834_v62 }
  0xb8   : > { %v2991_v12 = vpop.f32.mrf.mxu2 }
  0xb9   : > { %v2993_v14 = vpop.f32.mrf.mxu3  ;;  %v2995_v15 = vpop.f32.mrf.mxu1 }
  0xba   : > { %3527 = vst [vmem:[#allocation7_spill] sm:$0xff] %v2993_v14  ;;  %v572_v14 = vld [vmem:[%s2742_s27 + $0xe2] sm:$0xff] }
  0xbc   : > { %v2997_v20 = vpop.f32.mrf.mxu0 }
  0xc0   : > { %v3003_v27 = vpop.f32.mrf.mxu2 }
  0xc1   : > { %v3005_v28 = vpop.f32.mrf.mxu3  ;;  %v3007_v62 = vpop.f32.mrf.mxu1 }
  0xc2   : > { %3528 = vst [vmem:[#allocation8_spill] sm:$0xff] %v3005_v28 }
  0xc4   : > { %v3013_v36 = vpop.f32.mrf.mxu0  ;;  %2344 = vmatmul.msk.bf16.gmra.mxu1 %vm271_vm1, %v2979_v10 }
  0xc5   : > { %2361 = vmatmul.msk.bf16.gmra.mxu2 %vm271_vm1, %v3009_v29 }
  0xc6   : > { %2410 = vmatmul.msk.bf16.gmra.mxu3 %vm271_vm1, %v3011_v35 }
  0xc7   : > { %2459 = vmatmul.msk.bf16.gmra.mxu0 %vm271_vm1, %v2752_v17  ;;  %v3041_v17 = vpack.c.bf16 %v2387_v4, %v2386_v3 }
  0xc8   : > { %v3023_v37 = vpop.f32.mrf.mxu2 }
  0xc9   : > { %v3025_v38 = vpop.f32.mrf.mxu3  ;;  %v3027_v50 = vpop.f32.mrf.mxu1 }
  0xca   : > { %3531 = vst [vmem:[#allocation11_spill] sm:$0xff] %v3025_v38  ;;  %v571_v38 = vld [vmem:[%s2742_s27 + $0xda] sm:$0xff] }
  0xcb   : > { %v3059_v55 = vpack.c.bf16 %v572_v14, %v571_v38 }
  0xcc   : > { %v3029_v51 = vpop.f32.mrf.mxu0 }
  0xd0   : > { %v3035_v5 = vpop.f32.mrf.mxu2 }
  0xd1   : > { %v3037_v6 = vpop.f32.mrf.mxu3  ;;  %v473_v21 = vpop.f32.mrf.mxu1 }
  0xd2   : > { %3532 = vst [vmem:[#allocation12_spill] sm:$0xff] %v3037_v6  ;;  %v474_v23 = vadd.f32 %v473_v21, %v2917_v46 }
  0xd4   : > { %v1108_v26 = vpop.f32.mrf.mxu0  ;;  %2345 = vmatmul.msk.bf16.gmra.mxu1 %vm271_vm1, %v3011_v35  ;;  %v2388_v35 = vld [vmem:[%s2742_s27 + $0xf0] sm:$0xff] }
  0xd5   : > { %2362 = vmatmul.msk.bf16.gmra.mxu2 %vm271_vm1, %v3039_v22  ;;  %v2389_v22 = vld [vmem:[%s2742_s27 + $0xf8] sm:$0xff] }
  0xd6   : > { %2411 = vmatmul.msk.bf16.gmra.mxu3 %vm271_vm1, %v3041_v17 }
  0xd7   : > { %2460 = vmatmul.msk.bf16.gmra.mxu0 %vm271_vm1, %v2775_v31  ;;  %v3061_v31 = vpack.c.bf16 %v2389_v22, %v2388_v35  ;;  %v573_v22 = vld [vmem:[%s2742_s27 + $0xf2] sm:$0xff] }
  0xd8   : > { %v663_v52 = vpop.f32.mrf.mxu2 }
  0xd9   : > { %v886_v53 = vpop.f32.mrf.mxu3  ;;  %v743_v3 = vadd.f32 %v663_v52, %v474_v23  ;;  %v475_v4 = vpop.f32.mrf.mxu1 }
  0xda   : > { %v476_v46 = vadd.f32 %v475_v4, %v2933_v49  ;;  %v2391_v4 = vld [vmem:[%s2742_s27 + $0x110] sm:$0xff] }
  0xdb   : > { %v966_v21 = vadd.f32 %v886_v53, %v743_v3  ;;  %v574_v53 = vld [vmem:[%s2742_s27 + $0xfa] sm:$0xff]  ;;  %v2390_v3 = vld [vmem:[%s2742_s27 + $0x108] sm:$0xff] }
  0xdc   : > { %v1110_v6 = vpop.f32.mrf.mxu0 }
  0xdd   : > { %v3054_v28 = vadd.f32 %v1108_v26, %v966_v21 }
  0xe0   : > { %v665_v8 = vpop.f32.mrf.mxu2 }
  0xe1   : > { %v888_v60 = vpop.f32.mrf.mxu3  ;;  %v744_v29 = vadd.f32 %v665_v8, %v476_v46  ;;  %v478_v10 = vpop.f32.mrf.mxu1 }
  0xe2   : > { %v479_v23 = vadd.f32 %v478_v10, %v2949_v58 }
  0xe3   : > { %v967_v49 = vadd.f32 %v888_v60, %v744_v29 }
  0xe4   : > { %v1113_v52 = vpop.f32.mrf.mxu0  ;;  %2346 = vmatmul.msk.bf16.gmra.mxu1 %vm271_vm1, %v3041_v17 }
  0xe5   : > { %2363 = vmatmul.msk.bf16.gmra.mxu2 %vm271_vm1, %v3059_v55  ;;  %v3070_v8 = vadd.f32 %v1110_v6, %v967_v49 }
  0xe6   : > { %2412 = vmatmul.msk.bf16.gmra.mxu3 %vm271_vm1, %v3061_v31 }
  0xe7   : > { %3534 = vst [vmem:[#allocation14_spill] sm:$0xff] %v3070_v8  ;;  %2461 = vmatmul.msk.bf16.gmra.mxu0 %vm271_vm1, %v2796_v43  ;;  %v3081_v8 = vpack.c.bf16 %v574_v53, %v573_v22  ;;  %v3083_v43 = vpack.c.bf16 %v2391_v4, %v2390_v3  ;;  %v575_v53 = vld [vmem:[%s2742_s27 + $0x10a] sm:$0xff]  ;;  %v576_v4 = vld [vmem:[%s2742_s27 + $0x112] sm:$0xff] }
  0xe8   : > { %v668_v58 = vpop.f32.mrf.mxu2 }
  0xe9   : > { %v891_v60 = vpop.f32.mrf.mxu3  ;;  %v745_v10 = vadd.f32 %v668_v58, %v479_v23  ;;  %v480_v14 = vpop.f32.mrf.mxu1 }
  0xea   : > { %v481_v29 = vadd.f32 %v480_v14, %v2965_v2 }
  0xeb   : > { %v968_v35 = vadd.f32 %v891_v60, %v745_v10 }
  0xec   : > { %v1115_v38 = vpop.f32.mrf.mxu0 }
  0xed   : > { %v3076_v26 = vadd.f32 %v1113_v52, %v968_v35 }
  0xf0   : > { %v670_v46 = vpop.f32.mrf.mxu2 }
  0xf1   : > { %v893_v6 = vpop.f32.mrf.mxu3  ;;  %v746_v21 = vadd.f32 %v670_v46, %v481_v29  ;;  %v483_v49 = vpop.f32.mrf.mxu1  ;;  %v2392_v46 = vld [vmem:[%s2742_s27 + $0x120] sm:$0xff] }
  0xf2   : > { %v484_v23 = vadd.f32 %v483_v49, %v2981_v11 }
  0xf3   : > { %v969_v2 = vadd.f32 %v893_v6, %v746_v21  ;;  %v2393_v6 = vld [vmem:[%s2742_s27 + $0x128] sm:$0xff] }
  0xf4   : > { %v1118_v58 = vpop.f32.mrf.mxu0  ;;  %2347 = vmatmul.msk.bf16.gmra.mxu1 %vm271_vm1, %v3061_v31 }
  0xf5   : > { %2364 = vmatmul.msk.bf16.gmra.mxu2 %vm271_vm1, %v3081_v8  ;;  %v3092_v52 = vadd.f32 %v1115_v38, %v969_v2 }
  0xf6   : > { %2413 = vmatmul.msk.bf16.gmra.mxu3 %vm271_vm1, %v3083_v43 }
  0xf7   : > { %3535 = vst [vmem:[#allocation15_spill] sm:$0xff] %v3092_v52  ;;  %2462 = vmatmul.msk.bf16.gmra.mxu0 %vm271_vm1, %v2836_v63  ;;  %v3103_v52 = vpack.c.bf16 %v576_v4, %v575_v53  ;;  %v3105_v63 = vpack.c.bf16 %v2393_v6, %v2392_v46  ;;  %v577_v4 = vld [vmem:[%s2742_s27 + $0x122] sm:$0xff]  ;;  %v578_v6 = vld [vmem:[%s2742_s27 + $0x12a] sm:$0xff] }
  0xf8   : > { %v673_v11 = vpop.f32.mrf.mxu2 }
  0xf9   : > { %v896_v60 = vpop.f32.mrf.mxu3  ;;  %v747_v10 = vadd.f32 %v673_v11, %v484_v23  ;;  %v485_v14 = vpop.f32.mrf.mxu1 }
  0xfa   : > { %v486_v29 = vadd.f32 %v485_v14, %v2997_v20 }
  0xfb   : > { %v970_v35 = vadd.f32 %v896_v60, %v747_v10 }
  0xfc   : > { %v1120_v22 = vpop.f32.mrf.mxu0 }
  0xfd   : > { %v3098_v3 = vadd.f32 %v1118_v58, %v970_v35 }
 0x100   : > { %v675_v21 = vpop.f32.mrf.mxu2 }
 0x101   : > { %v898_v38 = vpop.f32.mrf.mxu3  ;;  %v748_v49 = vadd.f32 %v675_v21, %v486_v29  ;;  %v488_v2 = vpop.f32.mrf.mxu1  ;;  %v2394_v21 = vld [vmem:[%s2742_s27 + $0x138] sm:$0xff] }
 0x102   : > { %v489_v23 = vadd.f32 %v488_v2, %v3013_v36 }
 0x103   : > { %v971_v20 = vadd.f32 %v898_v38, %v748_v49  ;;  %v2395_v38 = vld [vmem:[%s2742_s27 + $0x140] sm:$0xff] }
 0x104   : > { %v1123_v11 = vpop.f32.mrf.mxu0  ;;  %2348 = vmatmul.msk.bf16.gmra.mxu1 %vm271_vm1, %v3083_v43 }
 0x105   : > { %2365 = vmatmul.msk.bf16.gmra.mxu2 %vm271_vm1, %v3103_v52  ;;  %v3114_v58 = vadd.f32 %v1120_v22, %v971_v20 }
 0x106   : > { %2414 = vmatmul.msk.bf16.gmra.mxu3 %vm271_vm1, %v3105_v63 }
 0x107   : > { %3536 = vst [vmem:[#allocation16_spill] sm:$0xff] %v3114_v58  ;;  %2463 = vmatmul.msk.bf16.gmra.mxu0 %vm271_vm1, %v2754_v18  ;;  %v3125_v58 = vpack.c.bf16 %v578_v6, %v577_v4  ;;  %v3127_v18 = vpack.c.bf16 %v2395_v38, %v2394_v21  ;;  %v579_v6 = vld [vmem:[%s2742_s27 + $0x13a] sm:$0xff]  ;;  %v580_v38 = vld [vmem:[%s2742_s27 + $0x142] sm:$0xff] }
 0x108   : > { %v678_v36 = vpop.f32.mrf.mxu2 }
 0x109   : > { %v901_v60 = vpop.f32.mrf.mxu3  ;;  %v749_v10 = vadd.f32 %v678_v36, %v489_v23  ;;  %v490_v14 = vpop.f32.mrf.mxu1 }
 0x10a   : > { %v491_v29 = vadd.f32 %v490_v14, %v3029_v51 }
 0x10b   : > { %v972_v35 = vadd.f32 %v901_v60, %v749_v10 }
 0x10c   : > { %v1125_v53 = vpop.f32.mrf.mxu0 }
 0x10d   : > { %v3120_v46 = vadd.f32 %v1123_v11, %v972_v35 }
 0x10f   : > { %3537 = vst [vmem:[#allocation17_spill] sm:$0xff] %v3120_v46  ;;  %v3147_v46 = vpack.c.bf16 %v580_v38, %v579_v6  ;;  %v581_v6 = vld [vmem:[%s2742_s27 + $0x152] sm:$0xff] }
 0x110   : > { %v680_v49 = vpop.f32.mrf.mxu2 }
 0x111   : > { %v903_v22 = vpop.f32.mrf.mxu3  ;;  %v750_v2 = vadd.f32 %v680_v49, %v491_v29  ;;  %v493_v20 = vpop.f32.mrf.mxu1  ;;  %v2396_v49 = vld [vmem:[%s2742_s27 + $0x150] sm:$0xff] }
 0x112   : > { %v494_v36 = vadd.f32 %v493_v20, %v2911_v39 }
 0x113   : > { %v973_v23 = vadd.f32 %v903_v22, %v750_v2  ;;  %v2397_v22 = vld [vmem:[%s2742_s27 + $0x158] sm:$0xff] }
 0x114   : > { %v1128_v51 = vpop.f32.mrf.mxu0  ;;  %2349 = vmatmul.msk.bf16.gmra.mxu1 %vm271_vm1, %v3105_v63  ;;  %v3149_v39 = vpack.c.bf16 %v2397_v22, %v2396_v49  ;;  %v582_v49 = vld [vmem:[%s2742_s27 + $0x15a] sm:$0xff]  ;;  %v2398_v22 = vld [vmem:[%s2742_s27 + $0x168] sm:$0xff] }
 0x115   : > { %2366 = vmatmul.msk.bf16.gmra.mxu2 %vm271_vm1, %v3125_v58  ;;  %v3135_v11 = vadd.f32 %v1125_v53, %v973_v23 }
 0x116   : > { %2415 = vmatmul.msk.bf16.gmra.mxu3 %vm271_vm1, %v3127_v18 }
 0x117   : > { %3538 = vst [vmem:[#allocation18_spill] sm:$0xff] %v3135_v11  ;;  %2464 = vmatmul.msk.bf16.gmra.mxu0 %vm271_vm1, %v2777_v32 }
 0x118   : > { %v683_v60 = vpop.f32.mrf.mxu2 }
 0x119   : > { %v906_v10 = vpop.f32.mrf.mxu3  ;;  %v751_v14 = vadd.f32 %v683_v60, %v494_v36  ;;  %v495_v29 = vpop.f32.mrf.mxu1 }
 0x11a   : > { %v496_v53 = vadd.f32 %v495_v29, %v2931_v48 }
 0x11b   : > { %v974_v35 = vadd.f32 %v906_v10, %v751_v14 }
 0x11c   : > { %v1130_v4 = vpop.f32.mrf.mxu0 }
 0x11d   : > { %v3141_v21 = vadd.f32 %v1128_v51, %v974_v35 }
 0x120   : > { %v685_v2 = vpop.f32.mrf.mxu2 }
 0x121   : > { %v908_v23 = vpop.f32.mrf.mxu3  ;;  %v752_v11 = vadd.f32 %v685_v2, %v496_v53  ;;  %v498_v32 = vpop.f32.mrf.mxu1  ;;  %v2399_v53 = vld [vmem:[%s2742_s27 + $0x170] sm:$0xff] }
 0x122   : > { %v499_v51 = vadd.f32 %v498_v32, %v2943_v30  ;;  %v3171_v30 = vpack.c.bf16 %v2399_v53, %v2398_v22  ;;  %v584_v53 = vld [vmem:[%s2742_s27 + $0x172] sm:$0xff] }
 0x123   : > { %v975_v20 = vadd.f32 %v908_v23, %v752_v11 }
 0x124   : > { %v1133_v36 = vpop.f32.mrf.mxu0  ;;  %2350 = vmatmul.msk.bf16.gmra.mxu1 %vm271_vm1, %v3127_v18 }
 0x125   : > { %2367 = vmatmul.msk.bf16.gmra.mxu2 %vm271_vm1, %v3147_v46  ;;  %v3157_v48 = vadd.f32 %v1130_v4, %v975_v20 }
 0x126   : > { %2416 = vmatmul.msk.bf16.gmra.mxu3 %vm271_vm1, %v3149_v39 }
 0x127   : > { %3539 = vst [vmem:[#allocation19_spill] sm:$0xff] %v3157_v48  ;;  %2465 = vmatmul.msk.bf16.gmra.mxu0 %vm271_vm1, %v2798_v44  ;;  %v3169_v48 = vpack.c.bf16 %v582_v49, %v581_v6  ;;  %v583_v49 = vld [vmem:[%s2742_s27 + $0x16a] sm:$0xff] }
 0x128   : > { %v688_v11 = vpop.f32.mrf.mxu2 }
 0x129   : > { %v911_v60 = vpop.f32.mrf.mxu3  ;;  %v753_v10 = vadd.f32 %v688_v11, %v499_v51  ;;  %v500_v14 = vpop.f32.mrf.mxu1 }
 0x12a   : > { %v501_v4 = vadd.f32 %v500_v14, %v2963_v61 }
 0x12b   : > { %v976_v29 = vadd.f32 %v911_v60, %v753_v10 }
 0x12c   : > { %v1135_v35 = vpop.f32.mrf.mxu0 }
 0x12d   : > { %v3163_v38 = vadd.f32 %v1133_v36, %v976_v29 }
 0x130   : > { %v690_v2 = vpop.f32.mrf.mxu2 }
 0x131   : > { %v913_v23 = vpop.f32.mrf.mxu3  ;;  %v754_v20 = vadd.f32 %v690_v2, %v501_v4  ;;  %v503_v44 = vpop.f32.mrf.mxu1  ;;  %v2400_v4 = vld [vmem:[%s2742_s27 + $0x180] sm:$0xff]  ;;  %v2401_v2 = vld [vmem:[%s2742_s27 + $0x188] sm:$0xff] }
 0x132   : > { %v504_v36 = vadd.f32 %v503_v44, %v2975_v42  ;;  %v3193_v44 = vpack.c.bf16 %v584_v53, %v583_v49 }
 0x133   : > { %v977_v32 = vadd.f32 %v913_v23, %v754_v20  ;;  %v2449_v23 = vld [vmem:[%s2742_s27 + $0x181] sm:$0xff]  ;;  %v2450_v20 = vld [vmem:[%s2742_s27 + $0x189] sm:$0xff] }
 0x134   : > { %v1138_v51 = vpop.f32.mrf.mxu0  ;;  %2351 = vmatmul.msk.bf16.gmra.mxu1 %vm271_vm1, %v3149_v39 }
 0x135   : > { %2368 = vmatmul.msk.bf16.gmra.mxu2 %vm271_vm1, %v3169_v48  ;;  %v3179_v61 = vadd.f32 %v1135_v35, %v977_v32 }
 0x136   : > { %2417 = vmatmul.msk.bf16.gmra.mxu3 %vm271_vm1, %v3171_v30 }
 0x137   : > { %3540 = vst [vmem:[#allocation20_spill] sm:$0xff] %v3179_v61  ;;  %2466 = vmatmul.msk.bf16.gmra.mxu0 %vm271_vm1, %v2838_v0 }
 0x138   : > { %v693_v11 = vpop.f32.mrf.mxu2 }
 0x139   : > { %v916_v60 = vpop.f32.mrf.mxu3  ;;  %v755_v10 = vadd.f32 %v693_v11, %v504_v36  ;;  %v505_v14 = vpop.f32.mrf.mxu1  ;;  %v823_v36 = vpack.c.bf16 %v2401_v2, %v2400_v4  ;;  %v1045_v11 = vpack.c.bf16 %v2450_v20, %v2449_v23 }
 0x13a   : > { %v506_v35 = vadd.f32 %v505_v14, %v2995_v15 }
 0x13b   : > { %v978_v29 = vadd.f32 %v916_v60, %v755_v10 }
 0x13c   : > { %v1140_v6 = vpop.f32.mrf.mxu0 }
 0x13d   : > { %v3185_v22 = vadd.f32 %v1138_v51, %v978_v29 }
 0x140   : > { %v695_v32 = vpop.f32.mrf.mxu2 }
 0x141   : > { %v918_v0 = vpop.f32.mrf.mxu3  ;;  %v756_v61 = vadd.f32 %v695_v32, %v506_v35  ;;  %v508_v42 = vpop.f32.mrf.mxu1 }
 0x142   : > { %v509_v51 = vadd.f32 %v508_v42, %v3007_v62 }
 0x143   : > { %v979_v60 = vadd.f32 %v918_v0, %v756_v61 }
 0x144   : > { %v1143_v10 = vpop.f32.mrf.mxu0  ;;  %2352 = vmatmul.msk.bf16.gmra.mxu1 %vm271_vm1, %v3171_v30 }
 0x145   : > { %2369 = vmatmul.msk.bf16.gmra.mxu2 %vm271_vm1, %v3193_v44  ;;  %v3200_v15 = vadd.f32 %v1140_v6, %v979_v60 }
 0x146   : > { %2418 = vmatmul.msk.bf16.gmra.mxu3 %vm271_vm1, %v823_v36 }
 0x147   : > { %2467 = vmatmul.msk.bf16.gmra.mxu0 %vm271_vm1, %v1045_v11 }
 0x148   : > { %v698_v14 = vpop.f32.mrf.mxu2 }
 0x149   : > { %v921_v29 = vpop.f32.mrf.mxu3  ;;  %v757_v49 = vadd.f32 %v698_v14, %v509_v51  ;;  %v510_v53 = vpop.f32.mrf.mxu1 }
 0x14a   : > { %v511_v35 = vadd.f32 %v510_v53, %v3027_v50 }
 0x14b   : > { %v980_v61 = vadd.f32 %v921_v29, %v757_v49 }
 0x14c   : > { %v1145_v4 = vpop.f32.mrf.mxu0 }
 0x14d   : > { %v3204_v2 = vadd.f32 %v1143_v10, %v980_v61 }
 0x150   : > { %v700_v23 = vpop.f32.mrf.mxu2 }
 0x151   : > { %v923_v20 = vpop.f32.mrf.mxu3  ;;  %v758_v32 = vadd.f32 %v700_v23, %v511_v35  ;;  %v513_v0 = vpop.f32.mrf.mxu1 }
 0x152   : > { %v514_v50 = vadd.f32 %v513_v0, %v2927_v13 }
 0x153   : > { %v981_v6 = vadd.f32 %v923_v20, %v758_v32 }
 0x154   : > { %v1148_v36 = vpop.f32.mrf.mxu0  ;;  %2501 = vmatmul.msk.bf16.vlgmr.msra.gmra.mxu1 %vm271_vm1, %v2864_v16 }
 0x155   : > { %2550 = vmatmul.msk.bf16.vlgmr.msra.gmra.mxu2 %vm271_vm1, %v2866_v19  ;;  %v3213_v62 = vadd.f32 %v1145_v4, %v981_v6 }
 0x156   : > { %2599 = vmatmul.msk.bf16.vlgmr.msra.gmra.mxu3 %vm271_vm1, %v2800_v45 }
 0x157   : > { %2648 = vmatmul.msk.bf16.vlgmr.msra.gmra.mxu0 %vm271_vm1, %v2879_v24 }
 0x158   : > { %v703_v42 = vpop.f32.mrf.mxu2 }
 0x159   : > { %v926_v11 = vpop.f32.mrf.mxu3  ;;  %v759_v60 = vadd.f32 %v703_v42, %v514_v50  ;;  %v515_v10 = vpop.f32.mrf.mxu1 }
 0x15a   : > { %v516_v19 = vadd.f32 %v515_v10, %v2939_v54 }
 0x15b   : > { %v982_v51 = vadd.f32 %v926_v11, %v759_v60 }
 0x15c   : > { %v1150_v14 = vpop.f32.mrf.mxu0 }
 0x15d   : > { %v3218_v16 = vadd.f32 %v1148_v36, %v982_v51  ;;  %v2570_v36 = vld [vmem:[%s2742_s27 + $0x61] sm:$0xff] }
 0x160   : > { %v705_v29 = vpop.f32.mrf.mxu2 }
 0x161   : > { %v928_v49 = vpop.f32.mrf.mxu3  ;;  %v760_v45 = vadd.f32 %v705_v29, %v516_v19  ;;  %v518_v53 = vpop.f32.mrf.mxu1 }
 0x162   : > { %v519_v54 = vadd.f32 %v518_v53, %v2959_v59 }
 0x163   : > { %v983_v61 = vadd.f32 %v928_v49, %v760_v45 }
 0x164   : > { %v1153_v4 = vpop.f32.mrf.mxu0  ;;  %2502 = vmatmul.msk.bf16.gmra.mxu1 %vm271_vm1, %v2879_v24 }
 0x165   : > { %2551 = vmatmul.msk.bf16.gmra.mxu2 %vm271_vm1, %v2881_v25  ;;  %v3227_v13 = vadd.f32 %v1150_v14, %v983_v61  ;;  %v2571_v25 = vld [vmem:[%s2742_s27 + $0x69] sm:$0xff] }
 0x166   : > { %2600 = vmatmul.msk.bf16.gmra.mxu3 %vm271_vm1, %v2840_v1  ;;  %v1699_v10 = vpack.c.bf16 %v2571_v25, %v2570_v36 }
 0x167   : > { %2649 = vmatmul.msk.bf16.gmra.mxu0 %vm271_vm1, %v2895_v33 }
 0x168   : > { %v708_v35 = vpop.f32.mrf.mxu2 }
 0x169   : > { %v931_v23 = vpop.f32.mrf.mxu3  ;;  %v761_v20 = vadd.f32 %v708_v35, %v519_v54  ;;  %v520_v32 = vpop.f32.mrf.mxu1  ;;  %v2573_v54 = vld [vmem:[%s2742_s27 + $0x81] sm:$0xff] }
 0x16a   : > { %v521_v50 = vadd.f32 %v520_v32, %v2971_v7 }
 0x16b   : > { %v984_v0 = vadd.f32 %v931_v23, %v761_v20 }
 0x16c   : > { %v1155_v6 = vpop.f32.mrf.mxu0 }
 0x16d   : > { %v3232_v24 = vadd.f32 %v1153_v4, %v984_v0 }
 0x170   : > { %v710_v1 = vpop.f32.mrf.mxu2 }
 0x171   : > { %v933_v42 = vpop.f32.mrf.mxu3  ;;  %v762_v11 = vadd.f32 %v710_v1, %v521_v50  ;;  %v523_v60 = vpop.f32.mrf.mxu1 }
 0x172   : > { %v524_v7 = vadd.f32 %v523_v60, %v2991_v12 }
 0x173   : > { %v985_v51 = vadd.f32 %v933_v42, %v762_v11 }
 0x174   : > { %v1158_v59 = vpop.f32.mrf.mxu0  ;;  %2503 = vmatmul.msk.bf16.gmra.mxu1 %vm271_vm1, %v2895_v33  ;;  %v2572_v33 = vld [vmem:[%s2742_s27 + $0x79] sm:$0xff] }
 0x175   : > { %2552 = vmatmul.msk.bf16.gmra.mxu2 %vm271_vm1, %v2897_v34  ;;  %v3242_v14 = vadd.f32 %v1155_v6, %v985_v51  ;;  %v1700_v0 = vpack.c.bf16 %v2573_v54, %v2572_v33  ;;  %v2575_v51 = vld [vmem:[%s2742_s27 + $0x99] sm:$0xff] }
 0x176   : > { %2601 = vmatmul.msk.bf16.gmra.mxu3 %vm271_vm1, %v1699_v10 }
 0x177   : > { %2650 = vmatmul.msk.bf16.gmra.mxu0 %vm271_vm1, %v2913_v40 }
 0x178   : > { %v713_v19 = vpop.f32.mrf.mxu2 }
 0x179   : > { %v936_v29 = vpop.f32.mrf.mxu3  ;;  %v763_v49 = vadd.f32 %v713_v19, %v524_v7  ;;  %v525_v45 = vpop.f32.mrf.mxu1 }
 0x17a   : > { %v526_v34 = vadd.f32 %v525_v45, %v3003_v27 }
 0x17b   : > { %v986_v53 = vadd.f32 %v936_v29, %v763_v49 }
 0x17c   : > { %v1160_v61 = vpop.f32.mrf.mxu0 }
 0x17d   : > { %v3247_v4 = vadd.f32 %v1158_v59, %v986_v53 }
 0x180   : > { %v715_v35 = vpop.f32.mrf.mxu2 }
 0x181   : > { %v938_v23 = vpop.f32.mrf.mxu3  ;;  %v764_v20 = vadd.f32 %v715_v35, %v526_v34  ;;  %v528_v32 = vpop.f32.mrf.mxu1 }
 0x182   : > { %v529_v27 = vadd.f32 %v528_v32, %v3023_v37  ;;  %v2577_v32 = vld [vmem:[%s2742_s27 + $0xb1] sm:$0xff] }
 0x183   : > { %v987_v6 = vadd.f32 %v938_v23, %v764_v20 }
 0x184   : > { %v1163_v12 = vpop.f32.mrf.mxu0  ;;  %2504 = vmatmul.msk.bf16.gmra.mxu1 %vm271_vm1, %v2913_v40  ;;  %v2574_v40 = vld [vmem:[%s2742_s27 + $0x91] sm:$0xff] }
 0x185   : > { %2553 = vmatmul.msk.bf16.gmra.mxu2 %vm271_vm1, %v2915_v41  ;;  %v3257_v36 = vadd.f32 %v1160_v61, %v987_v6  ;;  %v1701_v49 = vpack.c.bf16 %v2575_v51, %v2574_v40  ;;  %v3544_v40 = vld [vmem:[#allocation4_spill] sm:$0xff] }
 0x186   : > { %2602 = vmatmul.msk.bf16.gmra.mxu3 %vm271_vm1, %v1700_v0 }
 0x187   : > { %2651 = vmatmul.msk.bf16.gmra.mxu0 %vm271_vm1, %v2945_v56 }
 0x188   : > { %v718_v25 = vpop.f32.mrf.mxu2 }
 0x189   : > { %v941_v50 = vpop.f32.mrf.mxu3  ;;  %v765_v1 = vadd.f32 %v718_v25, %v529_v27  ;;  %v530_v42 = vpop.f32.mrf.mxu1 }
 0x18a   : > { %v531_v41 = vadd.f32 %v530_v42, %v3035_v5  ;;  %v3542_v42 = vld [vmem:[#allocation6_spill] sm:$0xff] }
 0x18b   : > { %v988_v11 = vadd.f32 %v941_v50, %v765_v1 }
 0x18c   : > { %v1165_v60 = vpop.f32.mrf.mxu0 }
 0x18d   : > { %v3262_v10 = vadd.f32 %v1163_v12, %v988_v11 }
 0x190   : > { %v720_v59 = vpop.f32.mrf.mxu2 }
 0x191   : > { %v943_v7 = vpop.f32.mrf.mxu3  ;;  %v766_v19 = vadd.f32 %v720_v59, %v531_v41  ;;  %v533_v29 = vpop.f32.mrf.mxu1 }
 0x192   : > { %v534_v5 = vadd.f32 %v533_v29, %v2929_v47 }
 0x193   : > { %v989_v45 = vadd.f32 %v943_v7, %v766_v19 }
 0x194   : > { %v1168_v37 = vpop.f32.mrf.mxu0  ;;  %2505 = vmatmul.msk.bf16.gmra.mxu1 %vm271_vm1, %v2945_v56  ;;  %v2576_v56 = vld [vmem:[%s2742_s27 + $0xa9] sm:$0xff] }
 0x195   : > { %2554 = vmatmul.msk.bf16.gmra.mxu2 %vm271_vm1, %v2947_v57  ;;  %v3272_v53 = vadd.f32 %v1165_v60, %v989_v45  ;;  %v3541_v57 = vld [vmem:[#allocation3_spill] sm:$0xff]  ;;  %v1702_v50 = vpack.c.bf16 %v2577_v32, %v2576_v56  ;;  %v3543_v60 = vld [vmem:[#allocation9_spill] sm:$0xff] }
 0x196   : > { %2603 = vmatmul.msk.bf16.gmra.mxu3 %vm271_vm1, %v1701_v49 }
 0x197   : > { %2652 = vmatmul.msk.bf16.gmra.mxu0 %vm271_vm1, %v2977_v9 }
 0x198   : > { %v723_v61 = vpop.f32.mrf.mxu2 }
 0x199   : > { %v946_v33 = vpop.f32.mrf.mxu3  ;;  %v767_v54 = vadd.f32 %v723_v61, %v534_v5  ;;  %v535_v34 = vpop.f32.mrf.mxu1  ;;  %v3545_v5 = vld [vmem:[#allocation5_spill] sm:$0xff] }
 0x19a   : > { %v536_v0 = vadd.f32 %v535_v34, %v3541_v57  ;;  %v3546_v57 = vld [vmem:[#allocation10_spill] sm:$0xff] }
 0x19b   : > { %v990_v35 = vadd.f32 %v946_v33, %v767_v54 }
 0x19c   : > { %v1170_v23 = vpop.f32.mrf.mxu0 }
 0x19d   : > { %v3277_v20 = vadd.f32 %v1168_v37, %v990_v35  ;;  %v2579_v37 = vld [vmem:[%s2742_s27 + $0xc9] sm:$0xff] }
 0x1a0   : > { %v725_v6 = vpop.f32.mrf.mxu2 }
 0x1a1   : > { %v948_v12 = vpop.f32.mrf.mxu3  ;;  %v768_v27 = vadd.f32 %v725_v6, %v536_v0  ;;  %v538_v25 = vpop.f32.mrf.mxu1  ;;  %v3547_v6 = vld [vmem:[#allocation13_spill] sm:$0xff] }
 0x1a2   : > { %v539_v51 = vadd.f32 %v538_v25, %v3544_v40 }
 0x1a3   : > { %v991_v1 = vadd.f32 %v948_v12, %v768_v27  ;;  %v3548_v12 = vld [vmem:[#allocation7_spill] sm:$0xff] }
 0x1a4   : > { %v1173_v47 = vpop.f32.mrf.mxu0  ;;  %2506 = vmatmul.msk.bf16.gmra.mxu1 %vm271_vm1, %v2977_v9  ;;  %v2578_v9 = vld [vmem:[%s2742_s27 + $0xc1] sm:$0xff] }
 0x1a5   : > { %2555 = vmatmul.msk.bf16.gmra.mxu2 %vm271_vm1, %v3542_v42  ;;  %v3287_v11 = vadd.f32 %v1170_v23, %v991_v1  ;;  %v1703_v23 = vpack.c.bf16 %v2579_v37, %v2578_v9 }
 0x1a6   : > { %2604 = vmatmul.msk.bf16.gmra.mxu3 %vm271_vm1, %v1702_v50 }
 0x1a7   : > { %2653 = vmatmul.msk.bf16.gmra.mxu0 %vm271_vm1, %v3543_v60 }
 0x1a8   : > { %v728_v41 = vpop.f32.mrf.mxu2 }
 0x1a9   : > { %v951_v59 = vpop.f32.mrf.mxu3  ;;  %v769_v7 = vadd.f32 %v728_v41, %v539_v51  ;;  %v540_v19 = vpop.f32.mrf.mxu1  ;;  %v2581_v41 = vld [vmem:[%s2742_s27 + $0xe1] sm:$0xff] }
 0x1aa   : > { %v541_v61 = vadd.f32 %v540_v19, %v3545_v5 }
 0x1ab   : > { %v992_v29 = vadd.f32 %v951_v59, %v769_v7  ;;  %v3549_v59 = vld [vmem:[#allocation8_spill] sm:$0xff] }
 0x1ac   : > { %v1175_v49 = vpop.f32.mrf.mxu0 }
 0x1ad   : > { %v3292_v45 = vadd.f32 %v1173_v47, %v992_v29 }
 0x1b0   : > { %v730_v33 = vpop.f32.mrf.mxu2 }
 0x1b1   : > { %v953_v54 = vpop.f32.mrf.mxu3  ;;  %v770_v34 = vadd.f32 %v730_v33, %v541_v61  ;;  %v543_v35 = vpop.f32.mrf.mxu1 }
 0x1b2   : > { %v544_v27 = vadd.f32 %v543_v35, %v3548_v12 }
 0x1b3   : > { %v993_v56 = vadd.f32 %v953_v54, %v770_v34  ;;  %v3550_v54 = vld [vmem:[#allocation11_spill] sm:$0xff] }
 0x1b4   : > { %v1178_v32 = vpop.f32.mrf.mxu0  ;;  %2507 = vmatmul.msk.bf16.gmra.mxu1 %vm271_vm1, %v3543_v60  ;;  %v2580_v60 = vld [vmem:[%s2742_s27 + $0xd9] sm:$0xff] }
 0x1b5   : > { %2556 = vmatmul.msk.bf16.gmra.mxu2 %vm271_vm1, %v3546_v57  ;;  %v3302_v0 = vadd.f32 %v1175_v49, %v993_v56  ;;  %v1704_v37 = vpack.c.bf16 %v2581_v41, %v2580_v60 }
 0x1b6   : > { %2605 = vmatmul.msk.bf16.gmra.mxu3 %vm271_vm1, %v1703_v23 }
 0x1b7   : > { %2654 = vmatmul.msk.bf16.gmra.mxu0 %vm271_vm1, %v3547_v6 }
 0x1b8   : > { %v733_v25 = vpop.f32.mrf.mxu2 }
 0x1b9   : > { %v956_v50 = vpop.f32.mrf.mxu3  ;;  %v771_v1 = vadd.f32 %v733_v25, %v544_v27  ;;  %v545_v47 = vpop.f32.mrf.mxu1  ;;  %v2583_v25 = vld [vmem:[%s2742_s27 + $0xf9] sm:$0xff] }
 0x1ba   : > { %v546_v7 = vadd.f32 %v545_v47, %v3549_v59 }
 0x1bb   : > { %v994_v42 = vadd.f32 %v956_v50, %v771_v1 }
 0x1bc   : > { %v1180_v40 = vpop.f32.mrf.mxu0 }
 0x1bd   : > { %v3307_v51 = vadd.f32 %v1178_v32, %v994_v42 }
 0x1c0   : > { %v735_v19 = vpop.f32.mrf.mxu2 }
 0x1c1   : > { %v958_v29 = vpop.f32.mrf.mxu3  ;;  %v772_v49 = vadd.f32 %v735_v19, %v546_v7  ;;  %v548_v9 = vpop.f32.mrf.mxu1 }
 0x1c2   : > { %v549_v34 = vadd.f32 %v548_v9, %v3550_v54 }
 0x1c3   : > { %v995_v5 = vadd.f32 %v958_v29, %v772_v49 }
 0x1c4   : > { %v1183_v61 = vpop.f32.mrf.mxu0  ;;  %2508 = vmatmul.msk.bf16.gmra.mxu1 %vm271_vm1, %v3547_v6  ;;  %v2582_v6 = vld [vmem:[%s2742_s27 + $0xf1] sm:$0xff] }
 0x1c5   : > { %2557 = vmatmul.msk.bf16.gmra.mxu2 %vm271_vm1, %v3041_v17  ;;  %v3317_v33 = vadd.f32 %v1180_v40, %v995_v5  ;;  %v3551_v17 = vld [vmem:[#allocation12_spill] sm:$0xff]  ;;  %v1705_v60 = vpack.c.bf16 %v2583_v25, %v2582_v6  ;;  %v2585_v5 = vld [vmem:[%s2742_s27 + $0x111] sm:$0xff] }
 0x1c6   : > { %2606 = vmatmul.msk.bf16.gmra.mxu3 %vm271_vm1, %v1704_v37  ;;  %v2584_v37 = vld [vmem:[%s2742_s27 + $0x109] sm:$0xff] }
 0x1c7   : > { %2655 = vmatmul.msk.bf16.gmra.mxu0 %vm271_vm1, %v3059_v55 }
 0x1c8   : > { %v738_v35 = vpop.f32.mrf.mxu2 }
 0x1c9   : > { %v961_v23 = vpop.f32.mrf.mxu3  ;;  %v773_v56 = vadd.f32 %v738_v35, %v549_v34  ;;  %v550_v32 = vpop.f32.mrf.mxu1 }
 0x1ca   : > { %v551_v50 = vadd.f32 %v550_v32, %v3551_v17 }
 0x1cb   : > { %v996_v57 = vadd.f32 %v961_v23, %v773_v56 }
 0x1cc   : > { %v1185_v12 = vpop.f32.mrf.mxu0 }
 0x1cd   : > { %v3322_v27 = vadd.f32 %v1183_v61, %v996_v57 }
 0x1d0   : > { %v740_v1 = vpop.f32.mrf.mxu2 }
 0x1d1   : > { %v963_v47 = vpop.f32.mrf.mxu3  ;;  %v774_v42 = vadd.f32 %v740_v1, %v551_v50  ;;  %v1330_v40 = vpop.f32.mrf.mxu1 }
 0x1d2   : > { %v1410_v61 = vadd.f32 %v1330_v40, %v3054_v28  ;;  %v3552_v28 = vld [vmem:[#allocation14_spill] sm:$0xff] }
 0x1d3   : > { %v997_v41 = vadd.f32 %v963_v47, %v774_v42 }
 0x1d4   : > { %v1997_v59 = vpop.f32.mrf.mxu0  ;;  %2509 = vmatmul.msk.bf16.gmra.mxu1 %vm271_vm1, %v3059_v55 }
 0x1d5   : > { %2558 = vmatmul.msk.bf16.gmra.mxu2 %vm271_vm1, %v3061_v31  ;;  %v3332_v7 = vadd.f32 %v1185_v12, %v997_v41  ;;  %v1706_v31 = vpack.c.bf16 %v2585_v5, %v2584_v37  ;;  %v2586_v41 = vld [vmem:[%s2742_s27 + $0x121] sm:$0xff] }
 0x1d6   : > { %2607 = vmatmul.msk.bf16.gmra.mxu3 %vm271_vm1, %v1705_v60 }
 0x1d7   : > { %2656 = vmatmul.msk.bf16.gmra.mxu0 %vm271_vm1, %v3081_v8 }
 0x1d8   : > { %v1553_v19 = vpop.f32.mrf.mxu2 }
 0x1d9   : > { %v1775_v29 = vpop.f32.mrf.mxu3  ;;  %v1332_v49 = vpop.f32.mrf.mxu1  ;;  %v1633_v34 = vadd.f32 %v1553_v19, %v1410_v61  ;;  %v2587_v19 = vld [vmem:[%s2742_s27 + $0x129] sm:$0xff] }
 0x1da   : > { %v1411_v32 = vadd.f32 %v1332_v49, %v3552_v28  ;;  %v1707_v5 = vpack.c.bf16 %v2587_v19, %v2586_v41 }
 0x1db   : > { %v1855_v56 = vadd.f32 %v1775_v29, %v1633_v34  ;;  %v3553_v29 = vld [vmem:[#allocation15_spill] sm:$0xff] }
 0x1dc   : > { %v1999_v9 = vpop.f32.mrf.mxu0 }
 0x1dd   : > { %v2077_v25 = vadd.f32 %v1997_v59, %v1855_v56 }
 0x1e0   : > { %v1555_v54 = vpop.f32.mrf.mxu2 }
 0x1e1   : > { %v1777_v55 = vpop.f32.mrf.mxu3  ;;  %v1335_v35 = vpop.f32.mrf.mxu1 }
 0x1e2   : > { %v1412_v57 = vadd.f32 %v1335_v35, %v3076_v26 }
 0x1e4   : > { %v2002_v23 = vpop.f32.mrf.mxu0  ;;  %2510 = vmatmul.msk.bf16.gmra.mxu1 %vm271_vm1, %v3081_v8  ;;  %v3351_v8 = vld [vmem:[%s3515_s2] ss:$0 sm:$0xff] }
 0x1e5   : > { %2559 = vmatmul.msk.bf16.gmra.mxu2 %vm271_vm1, %v3083_v43  ;;  %v1634_v43 = vadd.f32 %v1555_v54, %v1411_v32  ;;  %v2113_v42 = vadd.f32 %v3351_v8, %v2077_v25 }
 0x1e6   : > { %2608 = vmatmul.msk.bf16.gmra.mxu3 %vm271_vm1, %v1706_v31 }
 0x1e7   : > { %2657 = vmatmul.msk.bf16.gmra.mxu0 %vm271_vm1, %v3103_v52  ;;  %v1856_v40 = vadd.f32 %v1777_v55, %v1634_v43  ;;  %v2145_v61 = vmax.f32 %v2113_v42, 0.0 }
 0x1e8   : > { %v1558_v12 = vpop.f32.mrf.mxu2 }
 0x1e9   : > { %v1780_v6 = vpop.f32.mrf.mxu3  ;;  %v1635_v17 = vadd.f32 %v1558_v12, %v1412_v57  ;;  %v1337_v50 = vpop.f32.mrf.mxu1  ;;  %v2078_v34 = vadd.f32 %v1999_v9, %v1856_v40 }
 0x1ea   : > { %v1413_v59 = vadd.f32 %v1337_v50, %v3553_v29  ;;  %v2588_v50 = vld [vmem:[%s2742_s27 + $0x139] sm:$0xff] }
 0x1eb   : > { %v1857_v1 = vadd.f32 %v1780_v6, %v1635_v17  ;;  %v2114_v55 = vadd.f32 %v3351_v8, %v2078_v34 }
 0x1ec   : > { %v2004_v47 = vpop.f32.mrf.mxu0 }
 0x1ed   : > { %v2079_v60 = vadd.f32 %v2002_v23, %v1857_v1  ;;  %v2146_v12 = vmax.f32 %v2114_v55, 0.0  ;;  %v2589_v1 = vld [vmem:[%s2742_s27 + $0x141] sm:$0xff] }
 0x1ee   : > { %v1708_v41 = vpack.c.bf16 %v2589_v1, %v2588_v50 }
 0x1ef   : > { %v2115_v26 = vadd.f32 %v3351_v8, %v2079_v60 }
 0x1f0   : > { %v1560_v49 = vpop.f32.mrf.mxu2 }
 0x1f1   : > { %v1782_v37 = vpop.f32.mrf.mxu3  ;;  %v2147_v54 = vmax.f32 %v2115_v26, 0.0  ;;  %v1636_v35 = vadd.f32 %v1560_v49, %v1413_v59  ;;  %v1340_v31 = vpop.f32.mrf.mxu1  ;;  %v3554_v49 = vld [vmem:[#allocation16_spill] sm:$0xff] }
 0x1f3   : > { %v2177_v56 = vmax.f32 %v2145_v61, %v2147_v54  ;;  %v1858_v28 = vadd.f32 %v1782_v37, %v1636_v35 }
 0x1f4   : > { %v2007_v32 = vpop.f32.mrf.mxu0  ;;  %2511 = vmatmul.msk.bf16.gmra.mxu1 %vm271_vm1, %v3103_v52 }
 0x1f5   : > { %2194 = vst.msk [vmem:[#allocation2] sm:$0xff] %vm2193_vm2, %v2177_v56  ;;  %v2080_v23 = vadd.f32 %v2004_v47, %v1858_v28  ;;  %2560 = vmatmul.msk.bf16.gmra.mxu2 %vm271_vm1, %v3105_v63  ;;  %v1414_v63 = vadd.f32 %v1340_v31, %v3098_v3 }
 0x1f6   : > { %2609 = vmatmul.msk.bf16.gmra.mxu3 %vm271_vm1, %v1707_v5  ;;  %v3555_v5 = vld [vmem:[#allocation17_spill] sm:$0xff] }
 0x1f7   : > { %2658 = vmatmul.msk.bf16.gmra.mxu0 %vm271_vm1, %v3125_v58  ;;  %v2116_v9 = vadd.f32 %v3351_v8, %v2080_v23 }
 0x1f8   : > { %v1563_v57 = vpop.f32.mrf.mxu2 }
 0x1f9   : > { %v1785_v52 = vpop.f32.mrf.mxu3  ;;  %v2148_v6 = vmax.f32 %v2116_v9, 0.0  ;;  %v1342_v25 = vpop.f32.mrf.mxu1  ;;  %v1637_v40 = vadd.f32 %v1563_v57, %v1414_v63  ;;  %v2590_v57 = vld [vmem:[%s2742_s27 + $0x151] sm:$0xff] }
 0x1fa   : > { %v1415_v37 = vadd.f32 %v1342_v25, %v3554_v49 }
 0x1fb   : > { %v2178_v43 = vmax.f32 %v2146_v12, %v2148_v6  ;;  %v1859_v3 = vadd.f32 %v1785_v52, %v1637_v40  ;;  %v2591_v52 = vld [vmem:[%s2742_s27 + $0x159] sm:$0xff] }
 0x1fc   : > { %v2009_v17 = vpop.f32.mrf.mxu0  ;;  %v3556_v6 = vld [vmem:[#allocation18_spill] sm:$0xff]  ;;  %v1709_v1 = vpack.c.bf16 %v2591_v52, %v2590_v57 }
 0x1fd   : > { %2195 = vst.msk [vmem:[#allocation2 + $0x8] sm:$0xff] %vm2193_vm2, %v2178_v43  ;;  %v2081_v54 = vadd.f32 %v2007_v32, %v1859_v3 }
 0x1ff   : > { %v2117_v55 = vadd.f32 %v3351_v8, %v2081_v54 }
 0x200   : > { %v1565_v47 = vpop.f32.mrf.mxu2 }
 0x201   : > { %v1787_v42 = vpop.f32.mrf.mxu3  ;;  %v1345_v60 = vpop.f32.mrf.mxu1  ;;  %v1638_v35 = vadd.f32 %v1565_v47, %v1415_v37  ;;  %v2149_v63 = vmax.f32 %v2117_v55, 0.0 }
 0x202   : > { %v1416_v61 = vadd.f32 %v1345_v60, %v3555_v5 }
 0x203   : > { %v1860_v23 = vadd.f32 %v1787_v42, %v1638_v35 }
 0x204   : > { %v2012_v19 = vpop.f32.mrf.mxu0  ;;  %v2210_v26 = vld [vmem:[#allocation2] ss:$2 sm:$0xff]  ;;  %v2226_v29 = vld [vmem:[#allocation2 + $0x1] ss:$2 sm:$0xff]  ;;  %2512 = vmatmul.msk.bf16.gmra.mxu1 %vm271_vm1, %v3125_v58 }
 0x205   : > { %v2241_v59 = vmax.f32 %v2210_v26, %v2226_v29  ;;  %2561 = vmatmul.msk.bf16.gmra.mxu2 %vm271_vm1, %v3127_v18  ;;  %v2082_v32 = vadd.f32 %v2009_v17, %v1860_v23 }
 0x206   : > { %2610 = vmatmul.msk.bf16.gmra.mxu3 %vm271_vm1, %v1708_v41 }
 0x207   : > { %2659 = vmatmul.msk.bf16.gmra.mxu0 %vm271_vm1, %v3147_v46  ;;  %2249 = vst.msk [vmem:[%s3376_s16] sm:$0xff] %vm2193_vm2, %v2241_v59  ;;  %v2118_v42 = vadd.f32 %v3351_v8, %v2082_v32  ;;  %v2497_v32 = vld [vmem:[%s2742_s27 + $0x172] sm:$0xff] }
 0x208   : > { %v1568_v34 = vpop.f32.mrf.mxu2 }
 0x209   : > { %v1790_v58 = vpop.f32.mrf.mxu3  ;;  %v1639_v31 = vadd.f32 %v1568_v34, %v1416_v61  ;;  %v1347_v56 = vpop.f32.mrf.mxu1  ;;  %v2592_v34 = vld [vmem:[%s2742_s27 + $0x169] sm:$0xff] }
 0x20a   : > { %v1417_v25 = vadd.f32 %v1347_v56, %v3556_v6 }
 0x20b   : > { %v1861_v18 = vadd.f32 %v1790_v58, %v1639_v31  ;;  %v2593_v58 = vld [vmem:[%s2742_s27 + $0x171] sm:$0xff] }
 0x20c   : > { %v2014_v28 = vpop.f32.mrf.mxu0 }
 0x20d   : > { %v2083_v9 = vadd.f32 %v2012_v19, %v1861_v18  ;;  %v1710_v18 = vpack.c.bf16 %v2593_v58, %v2592_v34 }
 0x20f   : > { %v2119_v12 = vadd.f32 %v3351_v8, %v2083_v9 }
 0x210   : > { %v1570_v43 = vpop.f32.mrf.mxu2 }
 0x211   : > { %v1792_v50 = vpop.f32.mrf.mxu3  ;;  %v2151_v47 = vmax.f32 %v2119_v12, 0.0  ;;  %v1640_v40 = vadd.f32 %v1570_v43, %v1417_v25  ;;  %v1350_v60 = vpop.f32.mrf.mxu1 }
 0x213   : > { %v2179_v41 = vmax.f32 %v2149_v63, %v2151_v47  ;;  %v1862_v26 = vadd.f32 %v1792_v50, %v1640_v40  ;;  %v2545_v47 = vld [vmem:[%s2742_s27 + $0x180] sm:$0xff] }
 0x214   : > { %v2017_v29 = vpop.f32.mrf.mxu0  ;;  %2513 = vmatmul.msk.bf16.gmra.mxu1 %vm271_vm1, %v3147_v46  ;;  %v2150_v46 = vmax.f32 %v2118_v42, 0.0  ;;  %v2595_v42 = vld [vmem:[%s2742_s27 + $0x189] sm:$0xff] }
 0x215   : > { %2196 = vst.msk [vmem:[#allocation2 + $0x10] sm:$0xff] %vm2193_vm2, %v2179_v41  ;;  %v2084_v19 = vadd.f32 %v2014_v28, %v1862_v26  ;;  %2562 = vmatmul.msk.bf16.gmra.mxu2 %vm271_vm1, %v3149_v39  ;;  %v1418_v39 = vadd.f32 %v1350_v60, %v3141_v21  ;;  %v3557_v21 = vld [vmem:[#allocation19_spill] sm:$0xff] }
 0x216   : > { %2611 = vmatmul.msk.bf16.gmra.mxu3 %vm271_vm1, %v1709_v1  ;;  %v2594_v26 = vld [vmem:[%s2742_s27 + $0x181] sm:$0xff] }
 0x217   : > { %2660 = vmatmul.msk.bf16.gmra.mxu0 %vm271_vm1, %v3169_v48  ;;  %v2120_v17 = vadd.f32 %v3351_v8, %v2084_v19  ;;  %v1711_v34 = vpack.c.bf16 %v2595_v42, %v2594_v26 }
 0x218   : > { %v1573_v59 = vpop.f32.mrf.mxu2 }
 0x219   : > { %v1795_v3 = vpop.f32.mrf.mxu3  ;;  %v2152_v49 = vmax.f32 %v2120_v17, 0.0  ;;  %v1352_v37 = vpop.f32.mrf.mxu1  ;;  %v1641_v31 = vadd.f32 %v1573_v59, %v1418_v39  ;;  %v2643_v59 = vld [vmem:[%s2742_s27 + $0x182] sm:$0xff] }
 0x21a   : > { %v1419_v52 = vadd.f32 %v1352_v37, %v3557_v21 }
 0x21b   : > { %v2180_v5 = vmax.f32 %v2150_v46, %v2152_v49  ;;  %v1863_v57 = vadd.f32 %v1795_v3, %v1641_v31  ;;  %v2644_v3 = vld [vmem:[%s2742_s27 + $0x18a] sm:$0xff] }
 0x21c   : > { %v2019_v61 = vpop.f32.mrf.mxu0 }
 0x21d   : > { %2197 = vst.msk [vmem:[#allocation2 + $0x18] sm:$0xff] %vm2193_vm2, %v2180_v5  ;;  %v2085_v25 = vadd.f32 %v2017_v29, %v1863_v57  ;;  %v3558_v29 = vld [vmem:[#allocation20_spill] sm:$0xff] }
 0x21f   : > { %v2121_v40 = vadd.f32 %v3351_v8, %v2085_v25 }
 0x220   : > { %v1575_v54 = vpop.f32.mrf.mxu2 }
 0x221   : > { %v1797_v35 = vpop.f32.mrf.mxu3  ;;  %v1355_v56 = vpop.f32.mrf.mxu1  ;;  %v1642_v43 = vadd.f32 %v1575_v54, %v1419_v52  ;;  %v2153_v58 = vmax.f32 %v2121_v40, 0.0 }
 0x223   : > { %v1864_v60 = vadd.f32 %v1797_v35, %v1642_v43  ;;  %v2547_v43 = vld [vmem:[%s2742_s27 + $0x198] sm:$0xff] }
 0x224   : > { %v2022_v28 = vpop.f32.mrf.mxu0  ;;  %v2212_v55 = vld [vmem:[#allocation2 + $0x10] ss:$2 sm:$0xff]  ;;  %v2228_v23 = vld [vmem:[#allocation2 + $0x11] ss:$2 sm:$0xff]  ;;  %2514 = vmatmul.msk.bf16.gmra.mxu1 %vm271_vm1, %v3169_v48  ;;  %v1420_v48 = vadd.f32 %v1355_v56, %v3163_v38  ;;  %v2546_v38 = vld [vmem:[%s2742_s27 + $0x188] sm:$0xff]  ;;  %v1933_v56 = vpack.c.bf16 %v2644_v3, %v2643_v59 }
 0x225   : > { %v2242_v9 = vmax.f32 %v2212_v55, %v2228_v23  ;;  %2563 = vmatmul.msk.bf16.gmra.mxu2 %vm271_vm1, %v3171_v30  ;;  %v1489_v5 = vpack.c.bf16 %v2546_v38, %v2545_v47  ;;  %v2086_v39 = vadd.f32 %v2019_v61, %v1864_v60 }
 0x226   : > { %2612 = vmatmul.msk.bf16.gmra.mxu3 %vm271_vm1, %v1710_v18 }
 0x227   : > { %2661 = vmatmul.msk.bf16.gmra.mxu0 %vm271_vm1, %v3193_v44  ;;  %2250 = vst.msk [vmem:[%s3376_s16 + $0x8] sm:$0xff] %vm2193_vm2, %v2242_v9  ;;  %v2496_v44 = vld [vmem:[%s2742_s27 + $0x16a] sm:$0xff]  ;;  %v2122_v23 = vadd.f32 %v3351_v8, %v2086_v39 }
 0x228   : > { %v1578_v12 = vpop.f32.mrf.mxu2  ;;  %v1266_v37 = vpack.c.bf16 %v2497_v32, %v2496_v44  ;;  %v2645_v44 = vld [vmem:[%s2742_s27 + $0x19a] sm:$0xff]  ;;  %v2646_v32 = vld [vmem:[%s2742_s27 + $0x1a2] sm:$0xff] }
 0x229   : > { %v1800_v6 = vpop.f32.mrf.mxu3  ;;  %v1643_v30 = vadd.f32 %v1578_v12, %v1420_v48  ;;  %v1357_v50 = vpop.f32.mrf.mxu1  ;;  %v2154_v52 = vmax.f32 %v2122_v23, 0.0  ;;  %v1934_v42 = vpack.c.bf16 %v2646_v32, %v2645_v44 }
 0x22a   : > { %v1421_v17 = vadd.f32 %v1357_v50, %v3558_v29  ;;  %v2596_v50 = vld [vmem:[%s2742_s27 + $0x199] sm:$0xff] }
 0x22b   : > { %v1865_v1 = vadd.f32 %v1800_v6, %v1643_v30  ;;  %v2548_v30 = vld [vmem:[%s2742_s27 + $0x1a0] sm:$0xff] }
 0x22c   : > { %v2024_v63 = vpop.f32.mrf.mxu0  ;;  %v1490_v38 = vpack.c.bf16 %v2548_v30, %v2547_v43 }
 0x22d   : > { %v2087_v41 = vadd.f32 %v2022_v28, %v1865_v1  ;;  %v2597_v1 = vld [vmem:[%s2742_s27 + $0x1a1] sm:$0xff] }
 0x22e   : > { %v1712_v26 = vpack.c.bf16 %v2597_v1, %v2596_v50 }
 0x22f   : > { %v2123_v19 = vadd.f32 %v3351_v8, %v2087_v41 }
 0x230   : > { %v1580_v46 = vpop.f32.mrf.mxu2 }
 0x231   : > { %v1802_v49 = vpop.f32.mrf.mxu3  ;;  %v2155_v54 = vmax.f32 %v2123_v19, 0.0  ;;  %v1644_v31 = vadd.f32 %v1580_v46, %v1421_v17  ;;  %v1360_v35 = vpop.f32.mrf.mxu1 }
 0x233   : > { %v2181_v18 = vmax.f32 %v2153_v58, %v2155_v54  ;;  %v1866_v28 = vadd.f32 %v1802_v49, %v1644_v31 }
 0x234   : > { %v2027_v55 = vpop.f32.mrf.mxu0  ;;  %2515 = vmatmul.msk.bf16.gmra.mxu1 %vm271_vm1, %v1266_v37 }
 0x235   : > { %2198 = vst.msk [vmem:[#allocation2 + $0x20] sm:$0xff] %vm2193_vm2, %v2181_v18  ;;  %v2088_v9 = vadd.f32 %v2024_v63, %v1866_v28  ;;  %2564 = vmatmul.msk.bf16.gmra.mxu2 %vm271_vm1, %v1489_v5  ;;  %v1422_v63 = vadd.f32 %v1360_v35, %v3185_v22 }
 0x236   : > { %2613 = vmatmul.msk.bf16.gmra.mxu3 %vm271_vm1, %v1711_v34 }
 0x237   : > { %2662 = vmatmul.msk.bf16.gmra.mxu0 %vm271_vm1, %v1933_v56  ;;  %v2124_v61 = vadd.f32 %v3351_v8, %v2088_v9 }
 0x238   : > { %v1583_v57 = vpop.f32.mrf.mxu2 }
 0x239   : > { %v1805_v21 = vpop.f32.mrf.mxu3  ;;  %v2156_v48 = vmax.f32 %v2124_v61, 0.0  ;;  %v1362_v12 = vpop.f32.mrf.mxu1  ;;  %v1645_v60 = vadd.f32 %v1583_v57, %v1422_v63 }
 0x23a   : > { %v1423_v22 = vadd.f32 %v1362_v12, %v3200_v15 }
 0x23b   : > { %v2182_v6 = vmax.f32 %v2154_v52, %v2156_v48  ;;  %v1867_v3 = vadd.f32 %v1805_v21, %v1645_v60 }
 0x23c   : > { %v2029_v25 = vpop.f32.mrf.mxu0 }
 0x23d   : > { %2199 = vst.msk [vmem:[#allocation2 + $0x28] sm:$0xff] %vm2193_vm2, %v2182_v6  ;;  %v2089_v5 = vadd.f32 %v2027_v55, %v1867_v3 }
 0x23f   : > { %v2125_v35 = vadd.f32 %v3351_v8, %v2089_v5 }
 0x240   : > { %v1585_v47 = vpop.f32.mrf.mxu2 }
 0x241   : > { %v1807_v40 = vpop.f32.mrf.mxu3  ;;  %v1365_v41 = vpop.f32.mrf.mxu1  ;;  %v1646_v34 = vadd.f32 %v1585_v47, %v1423_v22  ;;  %v2157_v61 = vmax.f32 %v2125_v35, 0.0 }
 0x242   : > { %v1424_v46 = vadd.f32 %v1365_v41, %v3204_v2 }
 0x244   : > { %v2032_v19 = vpop.f32.mrf.mxu0  ;;  %v2214_v29 = vld [vmem:[#allocation2 + $0x20] ss:$2 sm:$0xff]  ;;  %v2230_v17 = vld [vmem:[#allocation2 + $0x21] ss:$2 sm:$0xff]  ;;  %2516 = vmatmul.msk.bf16.gmra.mxu1 %vm271_vm1, %v1933_v56  ;;  %v1868_v56 = vadd.f32 %v1807_v40, %v1646_v34 }
 0x245   : > { %v2243_v59 = vmax.f32 %v2214_v29, %v2230_v17  ;;  %2565 = vmatmul.msk.bf16.gmra.mxu2 %vm271_vm1, %v1490_v38 }
 0x246   : > { %2614 = vmatmul.msk.bf16.gmra.mxu3 %vm271_vm1, %v1712_v26  ;;  %v2090_v2 = vadd.f32 %v2029_v25, %v1868_v56 }
 0x247   : > { %2663 = vmatmul.msk.bf16.gmra.mxu0 %vm271_vm1, %v1934_v42  ;;  %2251 = vst.msk [vmem:[%s3376_s16 + $0x10] sm:$0xff] %vm2193_vm2, %v2243_v59 }
 0x248   : > { %v1588_v49 = vpop.f32.mrf.mxu2  ;;  %v2126_v6 = vadd.f32 %v3351_v8, %v2090_v2 }
 0x249   : > { %v1810_v37 = vpop.f32.mrf.mxu3  ;;  %v1647_v58 = vadd.f32 %v1588_v49, %v1424_v46  ;;  %v1367_v39 = vpop.f32.mrf.mxu1 }
 0x24a   : > { %v1425_v23 = vadd.f32 %v1367_v39, %v3213_v62  ;;  %v2158_v62 = vmax.f32 %v2126_v6, 0.0 }
 0x24b   : > { %v1869_v54 = vadd.f32 %v1810_v37, %v1647_v58 }
 0x24c   : > { %v2034_v31 = vpop.f32.mrf.mxu0 }
 0x24d   : > { %v2091_v18 = vadd.f32 %v2032_v19, %v1869_v54 }
 0x24f   : > { %v2127_v28 = vadd.f32 %v3351_v8, %v2091_v18 }
 0x250   : > { %v1590_v9 = vpop.f32.mrf.mxu2 }
 0x251   : > { %v1812_v15 = vpop.f32.mrf.mxu3  ;;  %v2159_v57 = vmax.f32 %v2127_v28, 0.0  ;;  %v1648_v21 = vadd.f32 %v1590_v9, %v1425_v23  ;;  %v1370_v55 = vpop.f32.mrf.mxu1 }
 0x252   : > { %v1426_v47 = vadd.f32 %v1370_v55, %v3218_v16 }
 0x253   : > { %v2183_v52 = vmax.f32 %v2157_v61, %v2159_v57  ;;  %v1870_v48 = vadd.f32 %v1812_v15, %v1648_v21 }
 0x254   : > { %v2037_v12 = vpop.f32.mrf.mxu0 }
 0x255   : > { %2200 = vst.msk [vmem:[#allocation2 + $0x30] sm:$0xff] %vm2193_vm2, %v2183_v52  ;;  %v2092_v43 = vadd.f32 %v2034_v31, %v1870_v48 }
 0x257   : > { %v2128_v30 = vadd.f32 %v3351_v8, %v2092_v43 }
 0x258   : > { %v1593_v50 = vpop.f32.mrf.mxu2 }
 0x259   : > { %v1815_v1 = vpop.f32.mrf.mxu3  ;;  %v2160_v63 = vmax.f32 %v2128_v30, 0.0  ;;  %v1372_v44 = vpop.f32.mrf.mxu1  ;;  %v1649_v41 = vadd.f32 %v1593_v50, %v1426_v47 }
 0x25a   : > { %v1427_v59 = vadd.f32 %v1372_v44, %v3227_v13 }
 0x25b   : > { %v2184_v25 = vmax.f32 %v2158_v62, %v2160_v63  ;;  %v1871_v17 = vadd.f32 %v1815_v1, %v1649_v41 }
 0x25c   : > { %v2039_v32 = vpop.f32.mrf.mxu0 }
 0x25d   : > { %2201 = vst.msk [vmem:[#allocation2 + $0x38] sm:$0xff] %vm2193_vm2, %v2184_v25  ;;  %v2093_v49 = vadd.f32 %v2037_v12, %v1871_v17 }
 0x25f   : > { %v2129_v39 = vadd.f32 %v3351_v8, %v2093_v49 }
 0x260   : > { %v1595_v40 = vpop.f32.mrf.mxu2 }
 0x261   : > { %v1817_v60 = vpop.f32.mrf.mxu3  ;;  %v1375_v38 = vpop.f32.mrf.mxu1  ;;  %v1650_v37 = vadd.f32 %v1595_v40, %v1427_v59  ;;  %v2161_v28 = vmax.f32 %v2129_v39, 0.0 }
 0x262   : > { %v1428_v3 = vadd.f32 %v1375_v38, %v3232_v24 }
 0x263   : > { %v1872_v54 = vadd.f32 %v1817_v60, %v1650_v37 }
 0x264   : > { %v2042_v26 = vpop.f32.mrf.mxu0  ;;  %v2216_v42 = vld [vmem:[#allocation2 + $0x30] ss:$2 sm:$0xff]  ;;  %v2232_v19 = vld [vmem:[#allocation2 + $0x31] ss:$2 sm:$0xff] }
 0x265   : > { %v2244_v29 = vmax.f32 %v2216_v42, %v2232_v19  ;;  %v2094_v24 = vadd.f32 %v2039_v32, %v1872_v54 }
 0x267   : > { %2252 = vst.msk [vmem:[%s3376_s16 + $0x18] sm:$0xff] %vm2193_vm2, %v2244_v29  ;;  %v2130_v21 = vadd.f32 %v3351_v8, %v2094_v24 }
 0x268   : > { %v1598_v22 = vpop.f32.mrf.mxu2 }
 0x269   : > { %v1820_v46 = vpop.f32.mrf.mxu3  ;;  %v1651_v16 = vadd.f32 %v1598_v22, %v1428_v3  ;;  %v1377_v5 = vpop.f32.mrf.mxu1 }
 0x26a   : > { %v1429_v56 = vadd.f32 %v1377_v5, %v3242_v14  ;;  %v2162_v14 = vmax.f32 %v2130_v21, 0.0 }
 0x26b   : > { %v1873_v34 = vadd.f32 %v1820_v46, %v1651_v16 }
 0x26c   : > { %v2044_v58 = vpop.f32.mrf.mxu0 }
 0x26d   : > { %v2095_v31 = vadd.f32 %v2042_v26, %v1873_v34 }
 0x26f   : > { %v2131_v35 = vadd.f32 %v3351_v8, %v2095_v31 }
 0x270   : > { %v1600_v18 = vpop.f32.mrf.mxu2 }
 0x271   : > { %v1822_v13 = vpop.f32.mrf.mxu3  ;;  %v2163_v23 = vmax.f32 %v2131_v35, 0.0  ;;  %v1652_v9 = vadd.f32 %v1600_v18, %v1429_v56  ;;  %v1380_v15 = vpop.f32.mrf.mxu1 }
 0x272   : > { %v1430_v1 = vadd.f32 %v1380_v15, %v3247_v4 }
 0x273   : > { %v2185_v61 = vmax.f32 %v2161_v28, %v2163_v23  ;;  %v1874_v2 = vadd.f32 %v1822_v13, %v1652_v9 }
 0x274   : > { %v2047_v57 = vpop.f32.mrf.mxu0 }
 0x275   : > { %2202 = vst.msk [vmem:[#allocation2 + $0x40] sm:$0xff] %vm2193_vm2, %v2185_v61  ;;  %v2096_v55 = vadd.f32 %v2044_v58, %v1874_v2 }
 0x277   : > { %v2132_v52 = vadd.f32 %v3351_v8, %v2096_v55 }
 0x278   : > { %v1603_v48 = vpop.f32.mrf.mxu2 }
 0x279   : > { %v1825_v12 = vpop.f32.mrf.mxu3  ;;  %v2164_v6 = vmax.f32 %v2132_v52, 0.0  ;;  %v1382_v43 = vpop.f32.mrf.mxu1  ;;  %v1653_v44 = vadd.f32 %v1603_v48, %v1430_v1 }
 0x27a   : > { %v1431_v38 = vadd.f32 %v1382_v43, %v3257_v36 }
 0x27b   : > { %v2186_v30 = vmax.f32 %v2162_v14, %v2164_v6  ;;  %v1875_v41 = vadd.f32 %v1825_v12, %v1653_v44 }
 0x27c   : > { %v2049_v50 = vpop.f32.mrf.mxu0 }
 0x27d   : > { %2203 = vst.msk [vmem:[#allocation2 + $0x48] sm:$0xff] %vm2193_vm2, %v2186_v30  ;;  %v2097_v29 = vadd.f32 %v2047_v57, %v1875_v41 }
 0x27f   : > { %v2133_v46 = vadd.f32 %v3351_v8, %v2097_v29 }
 0x280   : > { %v1605_v62 = vpop.f32.mrf.mxu2 }
 0x281   : > { %v1827_v63 = vpop.f32.mrf.mxu3  ;;  %v1385_v25 = vpop.f32.mrf.mxu1  ;;  %v1654_v17 = vadd.f32 %v1605_v62, %v1431_v38  ;;  %v2165_v58 = vmax.f32 %v2133_v46, 0.0 }
 0x282   : > { %v1432_v26 = vadd.f32 %v1385_v25, %v3262_v10 }
 0x283   : > { %v1876_v49 = vadd.f32 %v1827_v63, %v1654_v17 }
 0x284   : > { %v2052_v32 = vpop.f32.mrf.mxu0  ;;  %v2218_v47 = vld [vmem:[#allocation2 + $0x40] ss:$2 sm:$0xff]  ;;  %v2234_v40 = vld [vmem:[#allocation2 + $0x41] ss:$2 sm:$0xff] }
 0x285   : > { %v2245_v60 = vmax.f32 %v2218_v47, %v2234_v40  ;;  %v2098_v10 = vadd.f32 %v2049_v50, %v1876_v49 }
 0x287   : > { %2253 = vst.msk [vmem:[%s3376_s16 + $0x20] sm:$0xff] %vm2193_vm2, %v2245_v60  ;;  %v2134_v13 = vadd.f32 %v3351_v8, %v2098_v10 }
 0x288   : > { %v1608_v42 = vpop.f32.mrf.mxu2 }
 0x289   : > { %v1830_v19 = vpop.f32.mrf.mxu3  ;;  %v1655_v4 = vadd.f32 %v1608_v42, %v1432_v26  ;;  %v1387_v59 = vpop.f32.mrf.mxu1 }
 0x28a   : > { %v1433_v5 = vadd.f32 %v1387_v59, %v3272_v53  ;;  %v2166_v53 = vmax.f32 %v2134_v13, 0.0 }
 0x28b   : > { %v1877_v3 = vadd.f32 %v1830_v19, %v1655_v4 }
 0x28c   : > { %v2054_v22 = vpop.f32.mrf.mxu0 }
 0x28d   : > { %v2099_v37 = vadd.f32 %v2052_v32, %v1877_v3 }
 0x28f   : > { %v2135_v16 = vadd.f32 %v3351_v8, %v2099_v37 }
 0x290   : > { %v1610_v34 = vpop.f32.mrf.mxu2 }
 0x291   : > { %v1832_v36 = vpop.f32.mrf.mxu3  ;;  %v2167_v39 = vmax.f32 %v2135_v16, 0.0  ;;  %v1656_v54 = vadd.f32 %v1610_v34, %v1433_v5  ;;  %v1390_v31 = vpop.f32.mrf.mxu1 }
 0x292   : > { %v1434_v21 = vadd.f32 %v1390_v31, %v3277_v20 }
 0x293   : > { %v2187_v35 = vmax.f32 %v2165_v58, %v2167_v39  ;;  %v1878_v56 = vadd.f32 %v1832_v36, %v1656_v54 }
 0x294   : > { %v2057_v18 = vpop.f32.mrf.mxu0 }
 0x295   : > { %2204 = vst.msk [vmem:[#allocation2 + $0x50] sm:$0xff] %vm2193_vm2, %v2187_v35  ;;  %v2100_v28 = vadd.f32 %v2054_v22, %v1878_v56 }
 0x297   : > { %v2136_v24 = vadd.f32 %v3351_v8, %v2100_v28 }
 0x298   : > { %v1613_v23 = vpop.f32.mrf.mxu2 }
 0x299   : > { %v1835_v9 = vpop.f32.mrf.mxu3  ;;  %v2168_v15 = vmax.f32 %v2136_v24, 0.0  ;;  %v1392_v61 = vpop.f32.mrf.mxu1  ;;  %v1657_v48 = vadd.f32 %v1613_v23, %v1434_v21 }
 0x29a   : > { %v1435_v1 = vadd.f32 %v1392_v61, %v3287_v11 }
 0x29b   : > { %v2188_v2 = vmax.f32 %v2166_v53, %v2168_v15  ;;  %v1879_v50 = vadd.f32 %v1835_v9, %v1657_v48 }
 0x29c   : > { %v2059_v57 = vpop.f32.mrf.mxu0 }
 0x29d   : > { %2205 = vst.msk [vmem:[#allocation2 + $0x58] sm:$0xff] %vm2193_vm2, %v2188_v2  ;;  %v2101_v25 = vadd.f32 %v2057_v18, %v1879_v50 }
 0x29f   : > { %v2137_v41 = vadd.f32 %v3351_v8, %v2101_v25 }
 0x2a0   : > { %v1615_v55 = vpop.f32.mrf.mxu2 }
 0x2a1   : > { %v1837_v52 = vpop.f32.mrf.mxu3  ;;  %v1395_v12 = vpop.f32.mrf.mxu1  ;;  %v1658_v32 = vadd.f32 %v1615_v55, %v1435_v1  ;;  %v2169_v17 = vmax.f32 %v2137_v41, 0.0 }
 0x2a2   : > { %v1436_v62 = vadd.f32 %v1395_v12, %v3292_v45 }
 0x2a3   : > { %v1880_v38 = vadd.f32 %v1837_v52, %v1658_v32 }
 0x2a4   : > { %v2062_v14 = vpop.f32.mrf.mxu0  ;;  %v2220_v6 = vld [vmem:[#allocation2 + $0x50] ss:$2 sm:$0xff]  ;;  %v2236_v43 = vld [vmem:[#allocation2 + $0x51] ss:$2 sm:$0xff] }
 0x2a5   : > { %v2246_v30 = vmax.f32 %v2220_v6, %v2236_v43  ;;  %v2102_v45 = vadd.f32 %v2059_v57, %v1880_v38 }
 0x2a7   : > { %2254 = vst.msk [vmem:[%s3376_s16 + $0x28] sm:$0xff] %vm2193_vm2, %v2246_v30  ;;  %v2138_v49 = vadd.f32 %v3351_v8, %v2102_v45 }
 0x2a8   : > { %v1618_v63 = vpop.f32.mrf.mxu2 }
 0x2a9   : > { %v1840_v44 = vpop.f32.mrf.mxu3  ;;  %v1659_v20 = vadd.f32 %v1618_v63, %v1436_v62  ;;  %v1397_v47 = vpop.f32.mrf.mxu1 }
 0x2aa   : > { %v1437_v19 = vadd.f32 %v1397_v47, %v3302_v0  ;;  %v2170_v0 = vmax.f32 %v2138_v49, 0.0 }
 0x2ab   : > { %v1881_v40 = vadd.f32 %v1840_v44, %v1659_v20 }
 0x2ac   : > { %v2064_v60 = vpop.f32.mrf.mxu0 }
 0x2ad   : > { %v2103_v26 = vadd.f32 %v2062_v14, %v1881_v40 }
 0x2af   : > { %v2139_v42 = vadd.f32 %v3351_v8, %v2103_v26 }
 0x2b0   : > { %v1620_v29 = vpop.f32.mrf.mxu2 }
 0x2b1   : > { %v1842_v11 = vpop.f32.mrf.mxu3  ;;  %v2171_v4 = vmax.f32 %v2139_v42, 0.0  ;;  %v1660_v59 = vadd.f32 %v1620_v29, %v1437_v19  ;;  %v1400_v3 = vpop.f32.mrf.mxu1 }
 0x2b2   : > { %v1438_v54 = vadd.f32 %v1400_v3, %v3307_v51 }
 0x2b3   : > { %v2189_v22 = vmax.f32 %v2169_v17, %v2171_v4  ;;  %v1882_v46 = vadd.f32 %v1842_v11, %v1660_v59 }
 0x2b4   : > { %v2067_v16 = vpop.f32.mrf.mxu0 }
 0x2b5   : > { %2206 = vst.msk [vmem:[#allocation2 + $0x60] sm:$0xff] %vm2193_vm2, %v2189_v22  ;;  %v2104_v37 = vadd.f32 %v2064_v60, %v1882_v46 }
 0x2b7   : > { %v2140_v5 = vadd.f32 %v3351_v8, %v2104_v37 }
 0x2b8   : > { %v1623_v34 = vpop.f32.mrf.mxu2 }
 0x2b9   : > { %v1845_v36 = vpop.f32.mrf.mxu3  ;;  %v2172_v58 = vmax.f32 %v2140_v5, 0.0  ;;  %v1402_v10 = vpop.f32.mrf.mxu1  ;;  %v1661_v18 = vadd.f32 %v1623_v34, %v1438_v54 }
 0x2ba   : > { %v1439_v53 = vadd.f32 %v1402_v10, %v3317_v33 }
 0x2bb   : > { %v2190_v39 = vmax.f32 %v2170_v0, %v2172_v58  ;;  %v1883_v9 = vadd.f32 %v1845_v36, %v1661_v18 }
 0x2bc   : > { %v2069_v31 = vpop.f32.mrf.mxu0 }
 0x2bd   : > { %2207 = vst.msk [vmem:[#allocation2 + $0x68] sm:$0xff] %vm2193_vm2, %v2190_v39  ;;  %v2105_v57 = vadd.f32 %v2067_v16, %v1883_v9 }
 0x2bf   : > { %v2141_v12 = vadd.f32 %v3351_v8, %v2105_v57 }
 0x2c0   : > { %v1625_v35 = vpop.f32.mrf.mxu2 }
 0x2c1   : > { %v1847_v56 = vpop.f32.mrf.mxu3  ;;  %v1405_v13 = vpop.f32.mrf.mxu1  ;;  %v1662_v21 = vadd.f32 %v1625_v35, %v1439_v53  ;;  %v2173_v33 = vmax.f32 %v2141_v12, 0.0 }
 0x2c2   : > { %v1440_v15 = vadd.f32 %v1405_v13, %v3322_v27 }
 0x2c3   : > { %v1884_v14 = vadd.f32 %v1847_v56, %v1662_v21 }
 0x2c4   : > { %v2222_v28 = vld [vmem:[#allocation2 + $0x60] ss:$2 sm:$0xff]  ;;  %v2238_v24 = vld [vmem:[#allocation2 + $0x61] ss:$2 sm:$0xff]  ;;  %v2072_v55 = vpop.f32.mrf.mxu0 }
 0x2c5   : > { %v2247_v23 = vmax.f32 %v2222_v28, %v2238_v24  ;;  %v2106_v1 = vadd.f32 %v2069_v31, %v1884_v14 }
 0x2c7   : > { %2255 = vst.msk [vmem:[%s3376_s16 + $0x30] sm:$0xff] %vm2193_vm2, %v2247_v23  ;;  %v2142_v20 = vadd.f32 %v3351_v8, %v2106_v1 }
 0x2c8   : > { %v1628_v61 = vpop.f32.mrf.mxu2 }
 0x2c9   : > { %v1850_v2 = vpop.f32.mrf.mxu3  ;;  %v1663_v51 = vadd.f32 %v1628_v61, %v1440_v15  ;;  %v1407_v48 = vpop.f32.mrf.mxu1  ;;  %v2174_v60 = vmax.f32 %v2142_v20, 0.0 }
 0x2ca   : > { %v1441_v30 = vadd.f32 %v1407_v48, %v3332_v7 }
 0x2cb   : > { %v1885_v52 = vadd.f32 %v1850_v2, %v1663_v51 }
 0x2cc   : > { %v2074_v32 = vpop.f32.mrf.mxu0 }
 0x2cd   : > { %v2107_v6 = vadd.f32 %v2072_v55, %v1885_v52 }
 0x2cf   : > { %v2143_v43 = vadd.f32 %v3351_v8, %v2107_v6 }
 0x2d0   : > { %v1630_v50 = vpop.f32.mrf.mxu2 }
 0x2d1   : > { %v2175_v27 = vmax.f32 %v2143_v43, 0.0  ;;  %v1664_v62 = vadd.f32 %v1630_v50, %v1441_v30  ;;  %v1852_v63 = vpop.f32.mrf.mxu3 }
 0x2d3   : > { %v2191_v44 = vmax.f32 %v2173_v33, %v2175_v27  ;;  %v1886_v25 = vadd.f32 %v1852_v63, %v1664_v62 }
 0x2d5   : > { %2208 = vst.msk [vmem:[#allocation2 + $0x70] sm:$0xff] %vm2193_vm2, %v2191_v44  ;;  %v2108_v47 = vadd.f32 %v2074_v32, %v1886_v25 }
 0x2d7   : > { %v2144_v40 = vadd.f32 %v3351_v8, %v2108_v47 }
 0x2d9   : > { %v2176_v41 = vmax.f32 %v2144_v40, 0.0 }
 0x2db   : > { %v2192_v7 = vmax.f32 %v2174_v60, %v2176_v41 }
 0x2dd   : > { %2209 = vst.msk [vmem:[#allocation2 + $0x78] sm:$0xff] %vm2193_vm2, %v2192_v7 }
 0x2e4   : > { %v2224_v38 = vld [vmem:[#allocation2 + $0x70] ss:$2 sm:$0xff]  ;;  %v2240_v26 = vld [vmem:[#allocation2 + $0x71] ss:$2 sm:$0xff] }
 0x2e5   : > { %v2248_v42 = vmax.f32 %v2224_v38, %v2240_v26 }
 0x2e7   : > { %2256 = vst.msk [vmem:[%s3376_s16 + $0x38] sm:$0xff] %vm2193_vm2, %v2248_v42 }
 0x2e8 PF: > { %s13_s12 = sadd.s32 1, %s2686_s12  }
 0x2e9   : > { %p10_p4 = scmp.ge.s32.totalorder %s13_s12, 4  }
 0x2eb   :  { %12 = sbr.rel (!%p10_p4) target bundleno = 1 (0x1), region = 87 }

</bundles_post_ra>
